<compile_context>
chip_gen: v5e
topology: v5e:2x2
jax: 0.10.0
libtpu: 0.0.40
codegen_flags: <defaults>
</compile_context>

<pallas_src>
import functools

import jax
import jax.numpy as jnp
from jax.experimental import pallas as pl
from jax.experimental.pallas import tpu as pltpu

# ---------------- model config (small, synthetic) ----------------
VOCAB = 30
HIDDEN = 32
NUM_HEADS = 4
HEAD_DIM = HIDDEN // NUM_HEADS
INTERMEDIATE = 64
MAX_POS = 64
NUM_LAYERS = 2
CLASS_NUM = 9
PAD_N = 128                      # classifier output padded to one full lane width
LN_EPS = 1e-12
ATT_SCALE = 1.0 / (HEAD_DIM ** 0.5)

# Packed f32 vector-parameter table: one 128-lane row per bias / LayerNorm vector.
_ROW_EMB_G = 0
_ROW_EMB_B = 1
_ROWS_PER_LAYER = 8              # qkv_b, ao_b, a_ln_g, a_ln_b, i_b, o_b, o_ln_g, o_ln_b
_ROW_CLS_B = 2 + NUM_LAYERS * _ROWS_PER_LAYER
_N_VEC_ROWS = _ROW_CLS_B + 1


# ---------------- fused encoder kernel ----------------
def _encoder_kernel(ids_ref, mask_ref, wte_ref, pos_ref, vecs_ref,
                    w128_ref, iw_ref, ow_ref, out_ref, *, b_tile, seq):
    """One grid step == b_tile batch elements; all activations/weights in VMEM."""
    rows = b_tile * seq
    f32, bf16 = jnp.float32, jnp.bfloat16

    def vec(row, width):                           # (1, width) f32 parameter row
        return vecs_ref[row:row + 1, 0:width]

    def layer_norm(x, g, b):
        mu = jnp.mean(x, axis=-1, keepdims=True)
        var = jnp.mean(jnp.square(x - mu), axis=-1, keepdims=True)
        return (x - mu) * jax.lax.rsqrt(var + LN_EPS) * g + b

    def mm(x, w_bf16):                             # bf16 MXU path, f32 accumulate
        return jnp.dot(x.astype(bf16), w_bf16, preferred_element_type=f32)

    # ---- fused embedding lookup: one-hot @ table (MXU-friendly, no gather) ----
    ids = ids_ref[...].reshape(rows, 1)                                     # (R,1) i32
    onehot = (ids == jax.lax.broadcasted_iota(jnp.int32, (rows, VOCAB), 1)).astype(bf16)
    word = jnp.dot(onehot, wte_ref[...], preferred_element_type=f32)        # (R,H)
    pos = pos_ref[0:seq, :]                        # (S,H), token-type-0 row pre-folded
    emb = word.reshape(b_tile, seq, HIDDEN) + pos[None, :, :]
    h = layer_norm(emb.reshape(rows, HIDDEN),
                   vec(_ROW_EMB_G, HIDDEN), vec(_ROW_EMB_B, HIDDEN))        # (R,H) f32

    # ---- fused attention-mask -> additive bias ----
    bias = (1.0 - mask_ref[...].astype(f32)) * -10000.0                     # (b_tile,1,S)

    for l in range(NUM_LAYERS):                    # static unroll, L=2
        w_l = w128_ref[l]                          # (H,128) bf16 = [Wq|Wk|Wv|Wattn_out]
        qkv_w = w_l[:, :3 * HIDDEN]
        ao_w = w_l[:, 3 * HIDDEN:]
        base = 2 + l * _ROWS_PER_LAYER

        # Fused QKV projection over all folded batch rows at once.
        qkv = mm(h, qkv_w) + vec(base + 0, 3 * HIDDEN)                      # (R,3H) f32

        ctx_rows = []
        for b in range(b_tile):                    # static & tiny (== cdiv(B, 2) rows)
            x3 = qkv[b * seq:(b + 1) * seq].astype(bf16)                    # (S,3H) bf16
            # Head-major (NH,S,HD) operands built with static slices + stack
            # (pure tile placement); the score/PV matmuls below are single
            # batched dot_generals over the head axis instead of 8 per-head
            # micro-matmuls.
            # TODO(synk): replace with a reshape(S, NUM_HEADS, HEAD_DIM) view
            # once minor-dim-splitting reshapes lower reliably at these widths.
            def head_major(off, _x3=x3):
                return jnp.stack(
                    [_x3[:, off + hd * HEAD_DIM: off + (hd + 1) * HEAD_DIM]
                     for hd in range(NUM_HEADS)], axis=0)
            q = head_major(0)
            k = head_major(HIDDEN)
            v = head_major(2 * HIDDEN)

            # bf16 operands, f32 accumulate (fast MXU path); softmax stays f32.
            s = jnp.einsum("hqd,hkd->hqk", q, k,
                           preferred_element_type=f32) * ATT_SCALE          # (NH,S,S)
            s = s + bias[b]                                                 # +(1,S)
            s = s - jnp.max(s, axis=-1, keepdims=True)
            p = jnp.exp(s)
            p = p * pl.reciprocal(jnp.sum(p, axis=-1, keepdims=True), approx=True)
            ctx = jnp.einsum("hqk,hkd->hqd", p.astype(bf16), v,
                             preferred_element_type=f32)                    # (NH,S,HD)
            ctx_rows.append(
                jnp.concatenate([ctx[hd] for hd in range(NUM_HEADS)], axis=-1))
        ctx_all = ctx_rows[0] if b_tile == 1 else jnp.concatenate(ctx_rows, axis=0)

        attn_out = mm(ctx_all, ao_w) + vec(base + 1, HIDDEN)
        h1 = layer_norm(attn_out + h, vec(base + 2, HIDDEN), vec(base + 3, HIDDEN))

        inter = mm(h1, iw_ref[l]) + vec(base + 4, INTERMEDIATE)
        # exact (erf) GELU in f32, matching HF BERT hidden_act="gelu"
        inter = 0.5 * inter * (1.0 + jax.lax.erf(inter * 0.7071067811865476))
        ff = mm(inter, ow_ref[l]) + vec(base + 5, HIDDEN)
        h = layer_norm(ff + h1, vec(base + 6, HIDDEN), vec(base + 7, HIDDEN))

    # Classification head: lane-dense padded (R,128) bf16 store.
    logits = mm(h, w128_ref[NUM_LAYERS]) + vec(_ROW_CLS_B, PAD_N)           # (R,128)
    out_ref[...] = logits.reshape(b_tile, seq, PAD_N).astype(out_ref.dtype)


def bert_token_classifier(prep, ids3, mask3):
    """ids3: (B,S,1) int32; mask3: (B,1,S) int32. Returns padded (B,S,128) bf16 logits."""
    B, S, _ = ids3.shape
    # Fold batch rows per grid step, keeping >=2 steps for v7x's two TensorCores.
    b_tile = B // 2 if B % 2 == 0 else 1
    n_blocks = B // b_tile

    def batch_spec(shape):
        return pl.BlockSpec((b_tile,) + tuple(shape[1:]),
                            lambda i, _nd=len(shape): (i,) + (0,) * (_nd - 1))

    def resident_spec(a):
        # Grid-invariant weights: index_map constant -> DMA'd once, stays in VMEM.
        return pl.BlockSpec(a.shape, lambda i, _nd=a.ndim: (0,) * _nd)

    weights = [prep["wte"], prep["pos"], prep["vecs"],
               prep["w128"], prep["i_w"], prep["o_w"]]

    kernel = functools.partial(_encoder_kernel, b_tile=b_tile, seq=S)
    return pl.pallas_call(
        kernel,
        out_shape=jax.ShapeDtypeStruct((B, S, PAD_N), jnp.bfloat16),
        grid=(n_blocks,),
        in_specs=[batch_spec(ids3.shape), batch_spec(mask3.shape)]
                 + [resident_spec(w) for w in weights],
        out_specs=pl.BlockSpec((b_tile, S, PAD_N), lambda i: (i, 0, 0)),
        compiler_params=pltpu.CompilerParams(dimension_semantics=("parallel",)),
    )(ids3, mask3, *weights)


# ---------------- parameter init (deterministic, synthetic) ----------------
def init_params(key):
    def nrm(k, shape, scale=0.02):
        return (scale * jax.random.normal(k, shape)).astype(jnp.float32)

    keys = iter(jax.random.split(key, 16 + NUM_LAYERS * 16))
    params = {
        "word_emb": nrm(next(keys), (VOCAB, HIDDEN)),
        "pos_emb": nrm(next(keys), (MAX_POS, HIDDEN)),
        "type_emb": nrm(next(keys), (2, HIDDEN)),
        "emb_ln_g": 1.0 + nrm(next(keys), (HIDDEN,), 0.1),
        "emb_ln_b": nrm(next(keys), (HIDDEN,), 0.1),
        "cls_w": nrm(next(keys), (HIDDEN, CLASS_NUM)),
        "cls_b": nrm(next(keys), (CLASS_NUM,), 0.1),
        "layers": [],
    }
    for _ in range(NUM_LAYERS):
        params["layers"].append({
            "q_w": nrm(next(keys), (HIDDEN, HIDDEN)), "q_b": nrm(next(keys), (HIDDEN,)),
            "k_w": nrm(next(keys), (HIDDEN, HIDDEN)), "k_b": nrm(next(keys), (HIDDEN,)),
            "v_w": nrm(next(keys), (HIDDEN, HIDDEN)), "v_b": nrm(next(keys), (HIDDEN,)),
            "ao_w": nrm(next(keys), (HIDDEN, HIDDEN)), "ao_b": nrm(next(keys), (HIDDEN,)),
            "a_ln_g": 1.0 + nrm(next(keys), (HIDDEN,), 0.1),
            "a_ln_b": nrm(next(keys), (HIDDEN,), 0.1),
            "i_w": nrm(next(keys), (HIDDEN, INTERMEDIATE)),
            "i_b": nrm(next(keys), (INTERMEDIATE,)),
            "o_w": nrm(next(keys), (INTERMEDIATE, HIDDEN)),
            "o_b": nrm(next(keys), (HIDDEN,)),
            "o_ln_g": 1.0 + nrm(next(keys), (HIDDEN,), 0.1),
            "o_ln_b": nrm(next(keys), (HIDDEN,), 0.1),
        })
    return params


def prepare_params(params):
    """Pack everything into 6 kernel-resident arrays: a (19,128) f32 vector slab,
    an (L+1,H,128) bf16 weight slab [Wq|Wk|Wv|Wao]+padded classifier, stacked FFN
    weights (bf16), the bf16 word-embedding table, and the f32 pos(+type0) table."""
    bf16 = jnp.bfloat16
    layers = params["layers"]

    def pad_row(v):
        return jnp.zeros((PAD_N,), jnp.float32).at[:v.shape[0]].set(v.astype(jnp.float32))

    rows = [pad_row(params["emb_ln_g"]), pad_row(params["emb_ln_b"])]
    for l in layers:
        rows += [pad_row(jnp.concatenate([l["q_b"], l["k_b"], l["v_b"]])),
                 pad_row(l["ao_b"]),
                 pad_row(l["a_ln_g"]), pad_row(l["a_ln_b"]),
                 pad_row(l["i_b"]),
                 pad_row(l["o_b"]),
                 pad_row(l["o_ln_g"]), pad_row(l["o_ln_b"])]
    rows.append(pad_row(params["cls_b"]))
    vecs = jnp.stack(rows)                                                   # (19,128)
    assert vecs.shape[0] == _N_VEC_ROWS

    cls_pad = jnp.zeros((HIDDEN, PAD_N), jnp.float32).at[:, :CLASS_NUM].set(params["cls_w"])
    w128 = jnp.stack(
        [jnp.concatenate([l["q_w"], l["k_w"], l["v_w"], l["ao_w"]], axis=1)
         for l in layers] + [cls_pad]).astype(bf16)                          # (L+1,H,128)

    return {
        "wte": params["word_emb"].astype(bf16),                              # (VOCAB,H)
        "pos": params["pos_emb"] + params["type_emb"][0][None, :],           # (MAX_POS,H) f32
        "vecs": vecs,
        "w128": w128,
        "i_w": jnp.stack([l["i_w"] for l in layers]).astype(bf16),           # (L,H,I)
        "o_w": jnp.stack([l["o_w"] for l in layers]).astype(bf16),           # (L,I,H)
    }


# ---------------- forward (== TorchModel.forward, labels=None, use_crf=False) ----------------
def torch_model_forward(prep, x_ids, attention_mask):
    ids3 = x_ids.astype(jnp.int32)[:, :, None]                # (B,S,1) -> in-kernel one-hot
    mask3 = attention_mask.astype(jnp.int32)[:, None, :]      # (B,1,S) -> in-kernel bias
    out = bert_token_classifier(prep, ids3, mask3)            # (B,S,128) bf16
    # TODO(synk): CRF decode/loss (use_crf=True) and CrossEntropyLoss training
    # branches are not implemented; this reproduces the inference branch.
    return out[:, :, :CLASS_NUM].astype(jnp.float32)


# ---------------- pure-JAX f32 reference (tolerance check only) ----------------
def _reference_forward(params, x_ids, attention_mask):
    def ln(x, g, b):
        mu = x.mean(-1, keepdims=True)
        var = ((x - mu) ** 2).mean(-1, keepdims=True)
        return (x - mu) / jnp.sqrt(var + LN_EPS) * g + b

    B, S = x_ids.shape
    h = (params["word_emb"][x_ids] + params["pos_emb"][:S][None]
         + params["type_emb"][0][None, None])
    h = ln(h, params["emb_ln_g"], params["emb_ln_b"])
    bias = (1.0 - attention_mask.astype(jnp.float32))[:, None, None, :] * -10000.0
    for lyr in params["layers"]:
        def split(t):
            return t.reshape(B, S, NUM_HEADS, HEAD_DIM).transpose(0, 2, 1, 3)
        q = split(h @ lyr["q_w"] + lyr["q_b"])
        k = split(h @ lyr["k_w"] + lyr["k_b"])
        v = split(h @ lyr["v_w"] + lyr["v_b"])
        s = jnp.einsum("bhqd,bhkd->bhqk", q, k) * ATT_SCALE + bias
        p = jax.nn.softmax(s, axis=-1)
        ctx = jnp.einsum("bhqk,bhkd->bhqd", p, v).transpose(0, 2, 1, 3).reshape(B, S, HIDDEN)
        h1 = ln(ctx @ lyr["ao_w"] + lyr["ao_b"] + h, lyr["a_ln_g"], lyr["a_ln_b"])
        inter = h1 @ lyr["i_w"] + lyr["i_b"]
        inter = 0.5 * inter * (1.0 + jax.lax.erf(inter * 0.7071067811865476))
        h = ln(inter @ lyr["o_w"] + lyr["o_b"] + h1, lyr["o_ln_g"], lyr["o_ln_b"])
    return h @ params["cls_w"] + params["cls_b"]


if __name__ == "__main__":
    key = jax.random.PRNGKey(0)
    kp, kx = jax.random.split(key)
    params = init_params(kp)
    prep = prepare_params(params)

    B, S = 2, 8
    x = jax.random.randint(kx, (B, S), 0, VOCAB, dtype=jnp.int32)
    attention_mask = jnp.ones((B, S), dtype=jnp.int32).at[1, S - 2:].set(0)

    fwd = jax.jit(functools.partial(torch_model_forward, prep))
    out = fwd(x, attention_mask)
    jax.block_until_ready(out)

    assert out.shape == (B, S, CLASS_NUM)
    assert bool(jnp.all(jnp.isfinite(out)))
    ref = _reference_forward(params, x, attention_mask)
    assert float(jnp.max(jnp.abs(out - ref))) < 5e-2, "kernel mismatch vs f32 reference"
    print("KERNEL_OK")
</pallas_src>

<mosaic_0001>
module attributes {stable_mosaic.version = 11 : i64} {
  func.func @_encoder_kernel(%arg0: i32, %arg1: memref<1x8x1xi32, #tpu.memory_space<vmem>>, %arg2: memref<1x1x8xi32, #tpu.memory_space<vmem>>, %arg3: memref<30x32xbf16, #tpu.memory_space<vmem>>, %arg4: memref<64x32xf32, #tpu.memory_space<vmem>>, %arg5: memref<19x128xf32, #tpu.memory_space<vmem>>, %arg6: memref<3x32x128xbf16, #tpu.memory_space<vmem>>, %arg7: memref<2x32x64xbf16, #tpu.memory_space<vmem>>, %arg8: memref<2x64x32xbf16, #tpu.memory_space<vmem>>, %arg9: memref<1x8x128xbf16, #tpu.memory_space<vmem>>) attributes {dimension_semantics = [#tpu.dimension_semantics<parallel>], iteration_bounds = array<i64: 2>, scalar_prefetch = 0 : i64, scratch_operands = 0 : i64, tpu.core_type = #tpu.core_type<tc>, window_params = [{transform_indices = @transform_0, window_bounds = array<i64: 1, 8, 1>}, {transform_indices = @transform_1, window_bounds = array<i64: 1, 1, 8>}, {pipeline_mode = #tpu.pipeline_mode<synchronous>, transform_indices = @transform_2, window_bounds = array<i64: 30, 32>}, {pipeline_mode = #tpu.pipeline_mode<synchronous>, transform_indices = @transform_3, window_bounds = array<i64: 64, 32>}, {pipeline_mode = #tpu.pipeline_mode<synchronous>, transform_indices = @transform_4, window_bounds = array<i64: 19, 128>}, {pipeline_mode = #tpu.pipeline_mode<synchronous>, transform_indices = @transform_5, window_bounds = array<i64: 3, 32, 128>}, {pipeline_mode = #tpu.pipeline_mode<synchronous>, transform_indices = @transform_6, window_bounds = array<i64: 2, 32, 64>}, {pipeline_mode = #tpu.pipeline_mode<synchronous>, transform_indices = @transform_7, window_bounds = array<i64: 2, 64, 32>}, {transform_indices = @transform_8, window_bounds = array<i64: 1, 8, 128>}]} {
    %c0 = arith.constant 0 : index
    %c0_0 = arith.constant 0 : index
    %c0_1 = arith.constant 0 : index
    %0 = vector.load %arg1[%c0, %c0_0, %c0_1] : memref<1x8x1xi32, #tpu.memory_space<vmem>>, vector<1x8x1xi32>
    %1 = vector.shape_cast %0 : vector<1x8x1xi32> to vector<8x1xi32>
    %2 = tpu.iota {dimensions = array<i32: 1>} : vector<8x30xi32>
    %3 = vector.broadcast %1 : vector<8x1xi32> to vector<8x30xi32>
    %4 = arith.cmpi eq, %3, %2 : vector<8x30xi32>
    %5 = arith.extui %4 : vector<8x30xi1> to vector<8x30xi32>
    %6 = arith.sitofp %5 : vector<8x30xi32> to vector<8x30xf32>
    %7 = arith.truncf %6 : vector<8x30xf32> to vector<8x30xbf16>
    %c0_2 = arith.constant 0 : index
    %c0_3 = arith.constant 0 : index
    %8 = vector.load %arg3[%c0_2, %c0_3] : memref<30x32xbf16, #tpu.memory_space<vmem>>, vector<30x32xbf16>
    %cst = arith.constant dense<0.000000e+00> : vector<8x32xf32>
    %9 = tpu.matmul %7, %8, %cst {dimension_numbers = #tpu.dot_dimension_numbers<[1], [0], [0], [1], [0, 0, 1, 1], [], []>} : vector<8x30xbf16>, vector<30x32xbf16>, vector<8x32xf32> -> vector<8x32xf32>
    %c0_4 = arith.constant 0 : index
    %c0_5 = arith.constant 0 : index
    %10 = vector.load %arg4[%c0_4, %c0_5] : memref<64x32xf32, #tpu.memory_space<vmem>>, vector<8x32xf32>
    %11 = vector.shape_cast %9 : vector<8x32xf32> to vector<1x8x32xf32>
    %12 = vector.shape_cast %10 : vector<8x32xf32> to vector<1x8x32xf32>
    %13 = arith.addf %11, %12 : vector<1x8x32xf32>
    %14 = vector.shape_cast %13 : vector<1x8x32xf32> to vector<8x32xf32>
    %c0_6 = arith.constant 0 : index
    %c0_7 = arith.constant 0 : index
    %15 = vector.load %arg5[%c0_6, %c0_7] : memref<19x128xf32, #tpu.memory_space<vmem>>, vector<1x32xf32>
    %c1 = arith.constant 1 : index
    %c0_8 = arith.constant 0 : index
    %16 = vector.load %arg5[%c1, %c0_8] : memref<19x128xf32, #tpu.memory_space<vmem>>, vector<1x32xf32>
    %cst_9 = arith.constant dense<0.000000e+00> : vector<8xf32>
    %17 = vector.multi_reduction <add>, %14, %cst_9 [1] : vector<8x32xf32> to vector<8xf32>
    %18 = vector.shape_cast %17 : vector<8xf32> to vector<8x1xf32>
    %cst_10 = arith.constant 3.200000e+01 : f32
    %19 = vector.broadcast %cst_10 : f32 to vector<8x1xf32>
    %20 = arith.divf %18, %19 : vector<8x1xf32>
    %21 = vector.broadcast %20 : vector<8x1xf32> to vector<8x32xf32>
    %22 = arith.subf %14, %21 : vector<8x32xf32>
    %23 = arith.mulf %22, %22 : vector<8x32xf32>
    %cst_11 = arith.constant dense<0.000000e+00> : vector<8xf32>
    %24 = vector.multi_reduction <add>, %23, %cst_11 [1] : vector<8x32xf32> to vector<8xf32>
    %25 = vector.shape_cast %24 : vector<8xf32> to vector<8x1xf32>
    %cst_12 = arith.constant 3.200000e+01 : f32
    %26 = vector.broadcast %cst_12 : f32 to vector<8x1xf32>
    %27 = arith.divf %25, %26 : vector<8x1xf32>
    %28 = vector.broadcast %20 : vector<8x1xf32> to vector<8x32xf32>
    %29 = arith.subf %14, %28 : vector<8x32xf32>
    %cst_13 = arith.constant 9.99999996E-13 : f32
    %30 = vector.broadcast %cst_13 : f32 to vector<8x1xf32>
    %31 = arith.addf %27, %30 : vector<8x1xf32>
    %32 = math.rsqrt %31 : vector<8x1xf32>
    %33 = vector.broadcast %32 : vector<8x1xf32> to vector<8x32xf32>
    %34 = arith.mulf %29, %33 : vector<8x32xf32>
    %35 = vector.broadcast %15 : vector<1x32xf32> to vector<8x32xf32>
    %36 = arith.mulf %34, %35 : vector<8x32xf32>
    %37 = vector.broadcast %16 : vector<1x32xf32> to vector<8x32xf32>
    %38 = arith.addf %36, %37 : vector<8x32xf32>
    %c0_14 = arith.constant 0 : index
    %c0_15 = arith.constant 0 : index
    %c0_16 = arith.constant 0 : index
    %39 = vector.load %arg2[%c0_14, %c0_15, %c0_16] : memref<1x1x8xi32, #tpu.memory_space<vmem>>, vector<1x1x8xi32>
    %40 = arith.sitofp %39 : vector<1x1x8xi32> to vector<1x1x8xf32>
    %cst_17 = arith.constant 1.000000e+00 : f32
    %41 = vector.broadcast %cst_17 : f32 to vector<1x1x8xf32>
    %42 = arith.subf %41, %40 : vector<1x1x8xf32>
    %cst_18 = arith.constant -1.000000e+04 : f32
    %43 = vector.broadcast %cst_18 : f32 to vector<1x1x8xf32>
    %44 = arith.mulf %42, %43 : vector<1x1x8xf32>
    %c0_19 = arith.constant 0 : index
    %c0_20 = arith.constant 0 : index
    %c0_21 = arith.constant 0 : index
    %45 = vector.load %arg6[%c0_19, %c0_20, %c0_21] : memref<3x32x128xbf16, #tpu.memory_space<vmem>>, vector<1x32x128xbf16>
    %46 = vector.shape_cast %45 : vector<1x32x128xbf16> to vector<32x128xbf16>
    %47 = vector.extract_strided_slice %46 {offsets = [0, 0], sizes = [32, 96], strides = [1, 1]} : vector<32x128xbf16> to vector<32x96xbf16>
    %48 = vector.extract_strided_slice %46 {offsets = [0, 96], sizes = [32, 32], strides = [1, 1]} : vector<32x128xbf16> to vector<32x32xbf16>
    %49 = arith.truncf %38 : vector<8x32xf32> to vector<8x32xbf16>
    %cst_22 = arith.constant dense<0.000000e+00> : vector<8x96xf32>
    %50 = tpu.matmul %49, %47, %cst_22 {dimension_numbers = #tpu.dot_dimension_numbers<[1], [0], [0], [1], [0, 0, 1, 1], [], []>} : vector<8x32xbf16>, vector<32x96xbf16>, vector<8x96xf32> -> vector<8x96xf32>
    %c2 = arith.constant 2 : index
    %c0_23 = arith.constant 0 : index
    %51 = vector.load %arg5[%c2, %c0_23] : memref<19x128xf32, #tpu.memory_space<vmem>>, vector<1x96xf32>
    %52 = vector.broadcast %51 : vector<1x96xf32> to vector<8x96xf32>
    %53 = arith.addf %50, %52 : vector<8x96xf32>
    %54 = arith.truncf %53 : vector<8x96xf32> to vector<8x96xbf16>
    %55 = vector.extract_strided_slice %54 {offsets = [0, 0], sizes = [8, 8], strides = [1, 1]} : vector<8x96xbf16> to vector<8x8xbf16>
    %56 = vector.extract_strided_slice %54 {offsets = [0, 8], sizes = [8, 8], strides = [1, 1]} : vector<8x96xbf16> to vector<8x8xbf16>
    %57 = vector.extract_strided_slice %54 {offsets = [0, 16], sizes = [8, 8], strides = [1, 1]} : vector<8x96xbf16> to vector<8x8xbf16>
    %58 = vector.extract_strided_slice %54 {offsets = [0, 24], sizes = [8, 8], strides = [1, 1]} : vector<8x96xbf16> to vector<8x8xbf16>
    %59 = vector.shape_cast %55 : vector<8x8xbf16> to vector<1x8x8xbf16>
    %60 = vector.shape_cast %56 : vector<8x8xbf16> to vector<1x8x8xbf16>
    %61 = vector.shape_cast %57 : vector<8x8xbf16> to vector<1x8x8xbf16>
    %62 = vector.shape_cast %58 : vector<8x8xbf16> to vector<1x8x8xbf16>
    %63 = tpu.concatenate %59, %60, %61, %62 in 0 : vector<1x8x8xbf16>, vector<1x8x8xbf16>, vector<1x8x8xbf16>, vector<1x8x8xbf16> -> vector<4x8x8xbf16>
    %64 = vector.extract_strided_slice %54 {offsets = [0, 32], sizes = [8, 8], strides = [1, 1]} : vector<8x96xbf16> to vector<8x8xbf16>
    %65 = vector.extract_strided_slice %54 {offsets = [0, 40], sizes = [8, 8], strides = [1, 1]} : vector<8x96xbf16> to vector<8x8xbf16>
    %66 = vector.extract_strided_slice %54 {offsets = [0, 48], sizes = [8, 8], strides = [1, 1]} : vector<8x96xbf16> to vector<8x8xbf16>
    %67 = vector.extract_strided_slice %54 {offsets = [0, 56], sizes = [8, 8], strides = [1, 1]} : vector<8x96xbf16> to vector<8x8xbf16>
    %68 = vector.shape_cast %64 : vector<8x8xbf16> to vector<1x8x8xbf16>
    %69 = vector.shape_cast %65 : vector<8x8xbf16> to vector<1x8x8xbf16>
    %70 = vector.shape_cast %66 : vector<8x8xbf16> to vector<1x8x8xbf16>
    %71 = vector.shape_cast %67 : vector<8x8xbf16> to vector<1x8x8xbf16>
    %72 = tpu.concatenate %68, %69, %70, %71 in 0 : vector<1x8x8xbf16>, vector<1x8x8xbf16>, vector<1x8x8xbf16>, vector<1x8x8xbf16> -> vector<4x8x8xbf16>
    %73 = vector.extract_strided_slice %54 {offsets = [0, 64], sizes = [8, 8], strides = [1, 1]} : vector<8x96xbf16> to vector<8x8xbf16>
    %74 = vector.extract_strided_slice %54 {offsets = [0, 72], sizes = [8, 8], strides = [1, 1]} : vector<8x96xbf16> to vector<8x8xbf16>
    %75 = vector.extract_strided_slice %54 {offsets = [0, 80], sizes = [8, 8], strides = [1, 1]} : vector<8x96xbf16> to vector<8x8xbf16>
    %76 = vector.extract_strided_slice %54 {offsets = [0, 88], sizes = [8, 8], strides = [1, 1]} : vector<8x96xbf16> to vector<8x8xbf16>
    %77 = vector.shape_cast %73 : vector<8x8xbf16> to vector<1x8x8xbf16>
    %78 = vector.shape_cast %74 : vector<8x8xbf16> to vector<1x8x8xbf16>
    %79 = vector.shape_cast %75 : vector<8x8xbf16> to vector<1x8x8xbf16>
    %80 = vector.shape_cast %76 : vector<8x8xbf16> to vector<1x8x8xbf16>
    %81 = tpu.concatenate %77, %78, %79, %80 in 0 : vector<1x8x8xbf16>, vector<1x8x8xbf16>, vector<1x8x8xbf16>, vector<1x8x8xbf16> -> vector<4x8x8xbf16>
    "tpu.trace_start"() <{level = 10 : i32, message = "hqd,hkd->hqk"}> : () -> ()
    %cst_24 = arith.constant dense<0.000000e+00> : vector<4x8x8xf32>
    %82 = tpu.matmul %63, %72, %cst_24 {dimension_numbers = #tpu.dot_dimension_numbers<[2], [2], [1], [1], [0, 0, 0, 1, 1, 1], [0], [0]>} : vector<4x8x8xbf16>, vector<4x8x8xbf16>, vector<4x8x8xf32> -> vector<4x8x8xf32>
    "tpu.trace_stop"() : () -> ()
    %cst_25 = arith.constant 0.353553385 : f32
    %83 = vector.broadcast %cst_25 : f32 to vector<4x8x8xf32>
    %84 = arith.mulf %82, %83 : vector<4x8x8xf32>
    %85 = vector.shape_cast %44 : vector<1x1x8xf32> to vector<1x8xf32>
    %86 = vector.shape_cast %85 : vector<1x8xf32> to vector<1x1x8xf32>
    %87 = vector.broadcast %86 : vector<1x1x8xf32> to vector<4x8x8xf32>
    %88 = arith.addf %84, %87 : vector<4x8x8xf32>
    %cst_26 = arith.constant dense<0xFF800000> : vector<4x8xf32>
    %89 = vector.multi_reduction <maximumf>, %88, %cst_26 [2] : vector<4x8x8xf32> to vector<4x8xf32>
    %90 = vector.shape_cast %89 : vector<4x8xf32> to vector<4x8x1xf32>
    %91 = vector.broadcast %90 : vector<4x8x1xf32> to vector<4x8x8xf32>
    %92 = arith.subf %88, %91 : vector<4x8x8xf32>
    %93 = math.exp %92 : vector<4x8x8xf32>
    %cst_27 = arith.constant dense<0.000000e+00> : vector<4x8xf32>
    %94 = vector.multi_reduction <add>, %93, %cst_27 [2] : vector<4x8x8xf32> to vector<4x8xf32>
    %95 = vector.shape_cast %94 : vector<4x8xf32> to vector<4x8x1xf32>
    %96 = tpu.reciprocal %95 {approx = true} : vector<4x8x1xf32> -> vector<4x8x1xf32>
    %97 = vector.broadcast %96 : vector<4x8x1xf32> to vector<4x8x8xf32>
    %98 = arith.mulf %93, %97 : vector<4x8x8xf32>
    %99 = arith.truncf %98 : vector<4x8x8xf32> to vector<4x8x8xbf16>
    "tpu.trace_start"() <{level = 10 : i32, message = "hqk,hkd->hqd"}> : () -> ()
    %cst_28 = arith.constant dense<0.000000e+00> : vector<4x8x8xf32>
    %100 = tpu.matmul %99, %81, %cst_28 {dimension_numbers = #tpu.dot_dimension_numbers<[2], [1], [1], [2], [0, 0, 0, 1, 1, 2], [0], [0]>} : vector<4x8x8xbf16>, vector<4x8x8xbf16>, vector<4x8x8xf32> -> vector<4x8x8xf32>
    "tpu.trace_stop"() : () -> ()
    %101 = vector.extract_strided_slice %100 {offsets = [0, 0, 0], sizes = [1, 8, 8], strides = [1, 1, 1]} : vector<4x8x8xf32> to vector<1x8x8xf32>
    %102 = vector.shape_cast %101 : vector<1x8x8xf32> to vector<8x8xf32>
    %103 = vector.extract_strided_slice %100 {offsets = [1, 0, 0], sizes = [1, 8, 8], strides = [1, 1, 1]} : vector<4x8x8xf32> to vector<1x8x8xf32>
    %104 = vector.shape_cast %103 : vector<1x8x8xf32> to vector<8x8xf32>
    %105 = vector.extract_strided_slice %100 {offsets = [2, 0, 0], sizes = [1, 8, 8], strides = [1, 1, 1]} : vector<4x8x8xf32> to vector<1x8x8xf32>
    %106 = vector.shape_cast %105 : vector<1x8x8xf32> to vector<8x8xf32>
    %107 = vector.extract_strided_slice %100 {offsets = [3, 0, 0], sizes = [1, 8, 8], strides = [1, 1, 1]} : vector<4x8x8xf32> to vector<1x8x8xf32>
    %108 = vector.shape_cast %107 : vector<1x8x8xf32> to vector<8x8xf32>
    %109 = tpu.concatenate %102, %104, %106, %108 in 1 : vector<8x8xf32>, vector<8x8xf32>, vector<8x8xf32>, vector<8x8xf32> -> vector<8x32xf32>
    %110 = arith.truncf %109 : vector<8x32xf32> to vector<8x32xbf16>
    %cst_29 = arith.constant dense<0.000000e+00> : vector<8x32xf32>
    %111 = tpu.matmul %110, %48, %cst_29 {dimension_numbers = #tpu.dot_dimension_numbers<[1], [0], [0], [1], [0, 0, 1, 1], [], []>} : vector<8x32xbf16>, vector<32x32xbf16>, vector<8x32xf32> -> vector<8x32xf32>
    %c3 = arith.constant 3 : index
    %c0_30 = arith.constant 0 : index
    %112 = vector.load %arg5[%c3, %c0_30] : memref<19x128xf32, #tpu.memory_space<vmem>>, vector<1x32xf32>
    %113 = vector.broadcast %112 : vector<1x32xf32> to vector<8x32xf32>
    %114 = arith.addf %111, %113 : vector<8x32xf32>
    %115 = arith.addf %114, %38 : vector<8x32xf32>
    %c4 = arith.constant 4 : index
    %c0_31 = arith.constant 0 : index
    %116 = vector.load %arg5[%c4, %c0_31] : memref<19x128xf32, #tpu.memory_space<vmem>>, vector<1x32xf32>
    %c5 = arith.constant 5 : index
    %c0_32 = arith.constant 0 : index
    %117 = vector.load %arg5[%c5, %c0_32] : memref<19x128xf32, #tpu.memory_space<vmem>>, vector<1x32xf32>
    %cst_33 = arith.constant dense<0.000000e+00> : vector<8xf32>
    %118 = vector.multi_reduction <add>, %115, %cst_33 [1] : vector<8x32xf32> to vector<8xf32>
    %119 = vector.shape_cast %118 : vector<8xf32> to vector<8x1xf32>
    %cst_34 = arith.constant 3.200000e+01 : f32
    %120 = vector.broadcast %cst_34 : f32 to vector<8x1xf32>
    %121 = arith.divf %119, %120 : vector<8x1xf32>
    %122 = vector.broadcast %121 : vector<8x1xf32> to vector<8x32xf32>
    %123 = arith.subf %115, %122 : vector<8x32xf32>
    %124 = arith.mulf %123, %123 : vector<8x32xf32>
    %cst_35 = arith.constant dense<0.000000e+00> : vector<8xf32>
    %125 = vector.multi_reduction <add>, %124, %cst_35 [1] : vector<8x32xf32> to vector<8xf32>
    %126 = vector.shape_cast %125 : vector<8xf32> to vector<8x1xf32>
    %cst_36 = arith.constant 3.200000e+01 : f32
    %127 = vector.broadcast %cst_36 : f32 to vector<8x1xf32>
    %128 = arith.divf %126, %127 : vector<8x1xf32>
    %129 = vector.broadcast %121 : vector<8x1xf32> to vector<8x32xf32>
    %130 = arith.subf %115, %129 : vector<8x32xf32>
    %cst_37 = arith.constant 9.99999996E-13 : f32
    %131 = vector.broadcast %cst_37 : f32 to vector<8x1xf32>
    %132 = arith.addf %128, %131 : vector<8x1xf32>
    %133 = math.rsqrt %132 : vector<8x1xf32>
    %134 = vector.broadcast %133 : vector<8x1xf32> to vector<8x32xf32>
    %135 = arith.mulf %130, %134 : vector<8x32xf32>
    %136 = vector.broadcast %116 : vector<1x32xf32> to vector<8x32xf32>
    %137 = arith.mulf %135, %136 : vector<8x32xf32>
    %138 = vector.broadcast %117 : vector<1x32xf32> to vector<8x32xf32>
    %139 = arith.addf %137, %138 : vector<8x32xf32>
    %c0_38 = arith.constant 0 : index
    %c0_39 = arith.constant 0 : index
    %c0_40 = arith.constant 0 : index
    %140 = vector.load %arg7[%c0_38, %c0_39, %c0_40] : memref<2x32x64xbf16, #tpu.memory_space<vmem>>, vector<1x32x64xbf16>
    %141 = vector.shape_cast %140 : vector<1x32x64xbf16> to vector<32x64xbf16>
    %142 = arith.truncf %139 : vector<8x32xf32> to vector<8x32xbf16>
    %cst_41 = arith.constant dense<0.000000e+00> : vector<8x64xf32>
    %143 = tpu.matmul %142, %141, %cst_41 {dimension_numbers = #tpu.dot_dimension_numbers<[1], [0], [0], [1], [0, 0, 1, 1], [], []>} : vector<8x32xbf16>, vector<32x64xbf16>, vector<8x64xf32> -> vector<8x64xf32>
    %c6 = arith.constant 6 : index
    %c0_42 = arith.constant 0 : index
    %144 = vector.load %arg5[%c6, %c0_42] : memref<19x128xf32, #tpu.memory_space<vmem>>, vector<1x64xf32>
    %145 = vector.broadcast %144 : vector<1x64xf32> to vector<8x64xf32>
    %146 = arith.addf %143, %145 : vector<8x64xf32>
    %cst_43 = arith.constant 5.000000e-01 : f32
    %147 = vector.broadcast %cst_43 : f32 to vector<8x64xf32>
    %148 = arith.mulf %147, %146 : vector<8x64xf32>
    %cst_44 = arith.constant 0.707106769 : f32
    %149 = vector.broadcast %cst_44 : f32 to vector<8x64xf32>
    %150 = arith.mulf %146, %149 : vector<8x64xf32>
    %151 = math.erf %150 : vector<8x64xf32>
    %cst_45 = arith.constant 1.000000e+00 : f32
    %152 = vector.broadcast %cst_45 : f32 to vector<8x64xf32>
    %153 = arith.addf %152, %151 : vector<8x64xf32>
    %154 = arith.mulf %148, %153 : vector<8x64xf32>
    %c0_46 = arith.constant 0 : index
    %c0_47 = arith.constant 0 : index
    %c0_48 = arith.constant 0 : index
    %155 = vector.load %arg8[%c0_46, %c0_47, %c0_48] : memref<2x64x32xbf16, #tpu.memory_space<vmem>>, vector<1x64x32xbf16>
    %156 = vector.shape_cast %155 : vector<1x64x32xbf16> to vector<64x32xbf16>
    %157 = arith.truncf %154 : vector<8x64xf32> to vector<8x64xbf16>
    %cst_49 = arith.constant dense<0.000000e+00> : vector<8x32xf32>
    %158 = tpu.matmul %157, %156, %cst_49 {dimension_numbers = #tpu.dot_dimension_numbers<[1], [0], [0], [1], [0, 0, 1, 1], [], []>} : vector<8x64xbf16>, vector<64x32xbf16>, vector<8x32xf32> -> vector<8x32xf32>
    %c7 = arith.constant 7 : index
    %c0_50 = arith.constant 0 : index
    %159 = vector.load %arg5[%c7, %c0_50] : memref<19x128xf32, #tpu.memory_space<vmem>>, vector<1x32xf32>
    %160 = vector.broadcast %159 : vector<1x32xf32> to vector<8x32xf32>
    %161 = arith.addf %158, %160 : vector<8x32xf32>
    %162 = arith.addf %161, %139 : vector<8x32xf32>
    %c8 = arith.constant 8 : index
    %c0_51 = arith.constant 0 : index
    %163 = vector.load %arg5[%c8, %c0_51] : memref<19x128xf32, #tpu.memory_space<vmem>>, vector<1x32xf32>
    %c9 = arith.constant 9 : index
    %c0_52 = arith.constant 0 : index
    %164 = vector.load %arg5[%c9, %c0_52] : memref<19x128xf32, #tpu.memory_space<vmem>>, vector<1x32xf32>
    %cst_53 = arith.constant dense<0.000000e+00> : vector<8xf32>
    %165 = vector.multi_reduction <add>, %162, %cst_53 [1] : vector<8x32xf32> to vector<8xf32>
    %166 = vector.shape_cast %165 : vector<8xf32> to vector<8x1xf32>
    %cst_54 = arith.constant 3.200000e+01 : f32
    %167 = vector.broadcast %cst_54 : f32 to vector<8x1xf32>
    %168 = arith.divf %166, %167 : vector<8x1xf32>
    %169 = vector.broadcast %168 : vector<8x1xf32> to vector<8x32xf32>
    %170 = arith.subf %162, %169 : vector<8x32xf32>
    %171 = arith.mulf %170, %170 : vector<8x32xf32>
    %cst_55 = arith.constant dense<0.000000e+00> : vector<8xf32>
    %172 = vector.multi_reduction <add>, %171, %cst_55 [1] : vector<8x32xf32> to vector<8xf32>
    %173 = vector.shape_cast %172 : vector<8xf32> to vector<8x1xf32>
    %cst_56 = arith.constant 3.200000e+01 : f32
    %174 = vector.broadcast %cst_56 : f32 to vector<8x1xf32>
    %175 = arith.divf %173, %174 : vector<8x1xf32>
    %176 = vector.broadcast %168 : vector<8x1xf32> to vector<8x32xf32>
    %177 = arith.subf %162, %176 : vector<8x32xf32>
    %cst_57 = arith.constant 9.99999996E-13 : f32
    %178 = vector.broadcast %cst_57 : f32 to vector<8x1xf32>
    %179 = arith.addf %175, %178 : vector<8x1xf32>
    %180 = math.rsqrt %179 : vector<8x1xf32>
    %181 = vector.broadcast %180 : vector<8x1xf32> to vector<8x32xf32>
    %182 = arith.mulf %177, %181 : vector<8x32xf32>
    %183 = vector.broadcast %163 : vector<1x32xf32> to vector<8x32xf32>
    %184 = arith.mulf %182, %183 : vector<8x32xf32>
    %185 = vector.broadcast %164 : vector<1x32xf32> to vector<8x32xf32>
    %186 = arith.addf %184, %185 : vector<8x32xf32>
    %c1_58 = arith.constant 1 : index
    %c0_59 = arith.constant 0 : index
    %c0_60 = arith.constant 0 : index
    %187 = vector.load %arg6[%c1_58, %c0_59, %c0_60] : memref<3x32x128xbf16, #tpu.memory_space<vmem>>, vector<1x32x128xbf16>
    %188 = vector.shape_cast %187 : vector<1x32x128xbf16> to vector<32x128xbf16>
    %189 = vector.extract_strided_slice %188 {offsets = [0, 0], sizes = [32, 96], strides = [1, 1]} : vector<32x128xbf16> to vector<32x96xbf16>
    %190 = vector.extract_strided_slice %188 {offsets = [0, 96], sizes = [32, 32], strides = [1, 1]} : vector<32x128xbf16> to vector<32x32xbf16>
    %191 = arith.truncf %186 : vector<8x32xf32> to vector<8x32xbf16>
    %cst_61 = arith.constant dense<0.000000e+00> : vector<8x96xf32>
    %192 = tpu.matmul %191, %189, %cst_61 {dimension_numbers = #tpu.dot_dimension_numbers<[1], [0], [0], [1], [0, 0, 1, 1], [], []>} : vector<8x32xbf16>, vector<32x96xbf16>, vector<8x96xf32> -> vector<8x96xf32>
    %c10 = arith.constant 10 : index
    %c0_62 = arith.constant 0 : index
    %193 = vector.load %arg5[%c10, %c0_62] : memref<19x128xf32, #tpu.memory_space<vmem>>, vector<1x96xf32>
    %194 = vector.broadcast %193 : vector<1x96xf32> to vector<8x96xf32>
    %195 = arith.addf %192, %194 : vector<8x96xf32>
    %196 = arith.truncf %195 : vector<8x96xf32> to vector<8x96xbf16>
    %197 = vector.extract_strided_slice %196 {offsets = [0, 0], sizes = [8, 8], strides = [1, 1]} : vector<8x96xbf16> to vector<8x8xbf16>
    %198 = vector.extract_strided_slice %196 {offsets = [0, 8], sizes = [8, 8], strides = [1, 1]} : vector<8x96xbf16> to vector<8x8xbf16>
    %199 = vector.extract_strided_slice %196 {offsets = [0, 16], sizes = [8, 8], strides = [1, 1]} : vector<8x96xbf16> to vector<8x8xbf16>
    %200 = vector.extract_strided_slice %196 {offsets = [0, 24], sizes = [8, 8], strides = [1, 1]} : vector<8x96xbf16> to vector<8x8xbf16>
    %201 = vector.shape_cast %197 : vector<8x8xbf16> to vector<1x8x8xbf16>
    %202 = vector.shape_cast %198 : vector<8x8xbf16> to vector<1x8x8xbf16>
    %203 = vector.shape_cast %199 : vector<8x8xbf16> to vector<1x8x8xbf16>
    %204 = vector.shape_cast %200 : vector<8x8xbf16> to vector<1x8x8xbf16>
    %205 = tpu.concatenate %201, %202, %203, %204 in 0 : vector<1x8x8xbf16>, vector<1x8x8xbf16>, vector<1x8x8xbf16>, vector<1x8x8xbf16> -> vector<4x8x8xbf16>
    %206 = vector.extract_strided_slice %196 {offsets = [0, 32], sizes = [8, 8], strides = [1, 1]} : vector<8x96xbf16> to vector<8x8xbf16>
    %207 = vector.extract_strided_slice %196 {offsets = [0, 40], sizes = [8, 8], strides = [1, 1]} : vector<8x96xbf16> to vector<8x8xbf16>
    %208 = vector.extract_strided_slice %196 {offsets = [0, 48], sizes = [8, 8], strides = [1, 1]} : vector<8x96xbf16> to vector<8x8xbf16>
    %209 = vector.extract_strided_slice %196 {offsets = [0, 56], sizes = [8, 8], strides = [1, 1]} : vector<8x96xbf16> to vector<8x8xbf16>
    %210 = vector.shape_cast %206 : vector<8x8xbf16> to vector<1x8x8xbf16>
    %211 = vector.shape_cast %207 : vector<8x8xbf16> to vector<1x8x8xbf16>
    %212 = vector.shape_cast %208 : vector<8x8xbf16> to vector<1x8x8xbf16>
    %213 = vector.shape_cast %209 : vector<8x8xbf16> to vector<1x8x8xbf16>
    %214 = tpu.concatenate %210, %211, %212, %213 in 0 : vector<1x8x8xbf16>, vector<1x8x8xbf16>, vector<1x8x8xbf16>, vector<1x8x8xbf16> -> vector<4x8x8xbf16>
    %215 = vector.extract_strided_slice %196 {offsets = [0, 64], sizes = [8, 8], strides = [1, 1]} : vector<8x96xbf16> to vector<8x8xbf16>
    %216 = vector.extract_strided_slice %196 {offsets = [0, 72], sizes = [8, 8], strides = [1, 1]} : vector<8x96xbf16> to vector<8x8xbf16>
    %217 = vector.extract_strided_slice %196 {offsets = [0, 80], sizes = [8, 8], strides = [1, 1]} : vector<8x96xbf16> to vector<8x8xbf16>
    %218 = vector.extract_strided_slice %196 {offsets = [0, 88], sizes = [8, 8], strides = [1, 1]} : vector<8x96xbf16> to vector<8x8xbf16>
    %219 = vector.shape_cast %215 : vector<8x8xbf16> to vector<1x8x8xbf16>
    %220 = vector.shape_cast %216 : vector<8x8xbf16> to vector<1x8x8xbf16>
    %221 = vector.shape_cast %217 : vector<8x8xbf16> to vector<1x8x8xbf16>
    %222 = vector.shape_cast %218 : vector<8x8xbf16> to vector<1x8x8xbf16>
    %223 = tpu.concatenate %219, %220, %221, %222 in 0 : vector<1x8x8xbf16>, vector<1x8x8xbf16>, vector<1x8x8xbf16>, vector<1x8x8xbf16> -> vector<4x8x8xbf16>
    "tpu.trace_start"() <{level = 10 : i32, message = "hqd,hkd->hqk"}> : () -> ()
    %cst_63 = arith.constant dense<0.000000e+00> : vector<4x8x8xf32>
    %224 = tpu.matmul %205, %214, %cst_63 {dimension_numbers = #tpu.dot_dimension_numbers<[2], [2], [1], [1], [0, 0, 0, 1, 1, 1], [0], [0]>} : vector<4x8x8xbf16>, vector<4x8x8xbf16>, vector<4x8x8xf32> -> vector<4x8x8xf32>
    "tpu.trace_stop"() : () -> ()
    %cst_64 = arith.constant 0.353553385 : f32
    %225 = vector.broadcast %cst_64 : f32 to vector<4x8x8xf32>
    %226 = arith.mulf %224, %225 : vector<4x8x8xf32>
    %227 = vector.shape_cast %44 : vector<1x1x8xf32> to vector<1x8xf32>
    %228 = vector.shape_cast %227 : vector<1x8xf32> to vector<1x1x8xf32>
    %229 = vector.broadcast %228 : vector<1x1x8xf32> to vector<4x8x8xf32>
    %230 = arith.addf %226, %229 : vector<4x8x8xf32>
    %cst_65 = arith.constant dense<0xFF800000> : vector<4x8xf32>
    %231 = vector.multi_reduction <maximumf>, %230, %cst_65 [2] : vector<4x8x8xf32> to vector<4x8xf32>
    %232 = vector.shape_cast %231 : vector<4x8xf32> to vector<4x8x1xf32>
    %233 = vector.broadcast %232 : vector<4x8x1xf32> to vector<4x8x8xf32>
    %234 = arith.subf %230, %233 : vector<4x8x8xf32>
    %235 = math.exp %234 : vector<4x8x8xf32>
    %cst_66 = arith.constant dense<0.000000e+00> : vector<4x8xf32>
    %236 = vector.multi_reduction <add>, %235, %cst_66 [2] : vector<4x8x8xf32> to vector<4x8xf32>
    %237 = vector.shape_cast %236 : vector<4x8xf32> to vector<4x8x1xf32>
    %238 = tpu.reciprocal %237 {approx = true} : vector<4x8x1xf32> -> vector<4x8x1xf32>
    %239 = vector.broadcast %238 : vector<4x8x1xf32> to vector<4x8x8xf32>
    %240 = arith.mulf %235, %239 : vector<4x8x8xf32>
    %241 = arith.truncf %240 : vector<4x8x8xf32> to vector<4x8x8xbf16>
    "tpu.trace_start"() <{level = 10 : i32, message = "hqk,hkd->hqd"}> : () -> ()
    %cst_67 = arith.constant dense<0.000000e+00> : vector<4x8x8xf32>
    %242 = tpu.matmul %241, %223, %cst_67 {dimension_numbers = #tpu.dot_dimension_numbers<[2], [1], [1], [2], [0, 0, 0, 1, 1, 2], [0], [0]>} : vector<4x8x8xbf16>, vector<4x8x8xbf16>, vector<4x8x8xf32> -> vector<4x8x8xf32>
    "tpu.trace_stop"() : () -> ()
    %243 = vector.extract_strided_slice %242 {offsets = [0, 0, 0], sizes = [1, 8, 8], strides = [1, 1, 1]} : vector<4x8x8xf32> to vector<1x8x8xf32>
    %244 = vector.shape_cast %243 : vector<1x8x8xf32> to vector<8x8xf32>
    %245 = vector.extract_strided_slice %242 {offsets = [1, 0, 0], sizes = [1, 8, 8], strides = [1, 1, 1]} : vector<4x8x8xf32> to vector<1x8x8xf32>
    %246 = vector.shape_cast %245 : vector<1x8x8xf32> to vector<8x8xf32>
    %247 = vector.extract_strided_slice %242 {offsets = [2, 0, 0], sizes = [1, 8, 8], strides = [1, 1, 1]} : vector<4x8x8xf32> to vector<1x8x8xf32>
    %248 = vector.shape_cast %247 : vector<1x8x8xf32> to vector<8x8xf32>
    %249 = vector.extract_strided_slice %242 {offsets = [3, 0, 0], sizes = [1, 8, 8], strides = [1, 1, 1]} : vector<4x8x8xf32> to vector<1x8x8xf32>
    %250 = vector.shape_cast %249 : vector<1x8x8xf32> to vector<8x8xf32>
    %251 = tpu.concatenate %244, %246, %248, %250 in 1 : vector<8x8xf32>, vector<8x8xf32>, vector<8x8xf32>, vector<8x8xf32> -> vector<8x32xf32>
    %252 = arith.truncf %251 : vector<8x32xf32> to vector<8x32xbf16>
    %cst_68 = arith.constant dense<0.000000e+00> : vector<8x32xf32>
    %253 = tpu.matmul %252, %190, %cst_68 {dimension_numbers = #tpu.dot_dimension_numbers<[1], [0], [0], [1], [0, 0, 1, 1], [], []>} : vector<8x32xbf16>, vector<32x32xbf16>, vector<8x32xf32> -> vector<8x32xf32>
    %c11 = arith.constant 11 : index
    %c0_69 = arith.constant 0 : index
    %254 = vector.load %arg5[%c11, %c0_69] : memref<19x128xf32, #tpu.memory_space<vmem>>, vector<1x32xf32>
    %255 = vector.broadcast %254 : vector<1x32xf32> to vector<8x32xf32>
    %256 = arith.addf %253, %255 : vector<8x32xf32>
    %257 = arith.addf %256, %186 : vector<8x32xf32>
    %c12 = arith.constant 12 : index
    %c0_70 = arith.constant 0 : index
    %258 = vector.load %arg5[%c12, %c0_70] : memref<19x128xf32, #tpu.memory_space<vmem>>, vector<1x32xf32>
    %c13 = arith.constant 13 : index
    %c0_71 = arith.constant 0 : index
    %259 = vector.load %arg5[%c13, %c0_71] : memref<19x128xf32, #tpu.memory_space<vmem>>, vector<1x32xf32>
    %cst_72 = arith.constant dense<0.000000e+00> : vector<8xf32>
    %260 = vector.multi_reduction <add>, %257, %cst_72 [1] : vector<8x32xf32> to vector<8xf32>
    %261 = vector.shape_cast %260 : vector<8xf32> to vector<8x1xf32>
    %cst_73 = arith.constant 3.200000e+01 : f32
    %262 = vector.broadcast %cst_73 : f32 to vector<8x1xf32>
    %263 = arith.divf %261, %262 : vector<8x1xf32>
    %264 = vector.broadcast %263 : vector<8x1xf32> to vector<8x32xf32>
    %265 = arith.subf %257, %264 : vector<8x32xf32>
    %266 = arith.mulf %265, %265 : vector<8x32xf32>
    %cst_74 = arith.constant dense<0.000000e+00> : vector<8xf32>
    %267 = vector.multi_reduction <add>, %266, %cst_74 [1] : vector<8x32xf32> to vector<8xf32>
    %268 = vector.shape_cast %267 : vector<8xf32> to vector<8x1xf32>
    %cst_75 = arith.constant 3.200000e+01 : f32
    %269 = vector.broadcast %cst_75 : f32 to vector<8x1xf32>
    %270 = arith.divf %268, %269 : vector<8x1xf32>
    %271 = vector.broadcast %263 : vector<8x1xf32> to vector<8x32xf32>
    %272 = arith.subf %257, %271 : vector<8x32xf32>
    %cst_76 = arith.constant 9.99999996E-13 : f32
    %273 = vector.broadcast %cst_76 : f32 to vector<8x1xf32>
    %274 = arith.addf %270, %273 : vector<8x1xf32>
    %275 = math.rsqrt %274 : vector<8x1xf32>
    %276 = vector.broadcast %275 : vector<8x1xf32> to vector<8x32xf32>
    %277 = arith.mulf %272, %276 : vector<8x32xf32>
    %278 = vector.broadcast %258 : vector<1x32xf32> to vector<8x32xf32>
    %279 = arith.mulf %277, %278 : vector<8x32xf32>
    %280 = vector.broadcast %259 : vector<1x32xf32> to vector<8x32xf32>
    %281 = arith.addf %279, %280 : vector<8x32xf32>
    %c1_77 = arith.constant 1 : index
    %c0_78 = arith.constant 0 : index
    %c0_79 = arith.constant 0 : index
    %282 = vector.load %arg7[%c1_77, %c0_78, %c0_79] : memref<2x32x64xbf16, #tpu.memory_space<vmem>>, vector<1x32x64xbf16>
    %283 = vector.shape_cast %282 : vector<1x32x64xbf16> to vector<32x64xbf16>
    %284 = arith.truncf %281 : vector<8x32xf32> to vector<8x32xbf16>
    %cst_80 = arith.constant dense<0.000000e+00> : vector<8x64xf32>
    %285 = tpu.matmul %284, %283, %cst_80 {dimension_numbers = #tpu.dot_dimension_numbers<[1], [0], [0], [1], [0, 0, 1, 1], [], []>} : vector<8x32xbf16>, vector<32x64xbf16>, vector<8x64xf32> -> vector<8x64xf32>
    %c14 = arith.constant 14 : index
    %c0_81 = arith.constant 0 : index
    %286 = vector.load %arg5[%c14, %c0_81] : memref<19x128xf32, #tpu.memory_space<vmem>>, vector<1x64xf32>
    %287 = vector.broadcast %286 : vector<1x64xf32> to vector<8x64xf32>
    %288 = arith.addf %285, %287 : vector<8x64xf32>
    %cst_82 = arith.constant 5.000000e-01 : f32
    %289 = vector.broadcast %cst_82 : f32 to vector<8x64xf32>
    %290 = arith.mulf %289, %288 : vector<8x64xf32>
    %cst_83 = arith.constant 0.707106769 : f32
    %291 = vector.broadcast %cst_83 : f32 to vector<8x64xf32>
    %292 = arith.mulf %288, %291 : vector<8x64xf32>
    %293 = math.erf %292 : vector<8x64xf32>
    %cst_84 = arith.constant 1.000000e+00 : f32
    %294 = vector.broadcast %cst_84 : f32 to vector<8x64xf32>
    %295 = arith.addf %294, %293 : vector<8x64xf32>
    %296 = arith.mulf %290, %295 : vector<8x64xf32>
    %c1_85 = arith.constant 1 : index
    %c0_86 = arith.constant 0 : index
    %c0_87 = arith.constant 0 : index
    %297 = vector.load %arg8[%c1_85, %c0_86, %c0_87] : memref<2x64x32xbf16, #tpu.memory_space<vmem>>, vector<1x64x32xbf16>
    %298 = vector.shape_cast %297 : vector<1x64x32xbf16> to vector<64x32xbf16>
    %299 = arith.truncf %296 : vector<8x64xf32> to vector<8x64xbf16>
    %cst_88 = arith.constant dense<0.000000e+00> : vector<8x32xf32>
    %300 = tpu.matmul %299, %298, %cst_88 {dimension_numbers = #tpu.dot_dimension_numbers<[1], [0], [0], [1], [0, 0, 1, 1], [], []>} : vector<8x64xbf16>, vector<64x32xbf16>, vector<8x32xf32> -> vector<8x32xf32>
    %c15 = arith.constant 15 : index
    %c0_89 = arith.constant 0 : index
    %301 = vector.load %arg5[%c15, %c0_89] : memref<19x128xf32, #tpu.memory_space<vmem>>, vector<1x32xf32>
    %302 = vector.broadcast %301 : vector<1x32xf32> to vector<8x32xf32>
    %303 = arith.addf %300, %302 : vector<8x32xf32>
    %304 = arith.addf %303, %281 : vector<8x32xf32>
    %c16 = arith.constant 16 : index
    %c0_90 = arith.constant 0 : index
    %305 = vector.load %arg5[%c16, %c0_90] : memref<19x128xf32, #tpu.memory_space<vmem>>, vector<1x32xf32>
    %c17 = arith.constant 17 : index
    %c0_91 = arith.constant 0 : index
    %306 = vector.load %arg5[%c17, %c0_91] : memref<19x128xf32, #tpu.memory_space<vmem>>, vector<1x32xf32>
    %cst_92 = arith.constant dense<0.000000e+00> : vector<8xf32>
    %307 = vector.multi_reduction <add>, %304, %cst_92 [1] : vector<8x32xf32> to vector<8xf32>
    %308 = vector.shape_cast %307 : vector<8xf32> to vector<8x1xf32>
    %cst_93 = arith.constant 3.200000e+01 : f32
    %309 = vector.broadcast %cst_93 : f32 to vector<8x1xf32>
    %310 = arith.divf %308, %309 : vector<8x1xf32>
    %311 = vector.broadcast %310 : vector<8x1xf32> to vector<8x32xf32>
    %312 = arith.subf %304, %311 : vector<8x32xf32>
    %313 = arith.mulf %312, %312 : vector<8x32xf32>
    %cst_94 = arith.constant dense<0.000000e+00> : vector<8xf32>
    %314 = vector.multi_reduction <add>, %313, %cst_94 [1] : vector<8x32xf32> to vector<8xf32>
    %315 = vector.shape_cast %314 : vector<8xf32> to vector<8x1xf32>
    %cst_95 = arith.constant 3.200000e+01 : f32
    %316 = vector.broadcast %cst_95 : f32 to vector<8x1xf32>
    %317 = arith.divf %315, %316 : vector<8x1xf32>
    %318 = vector.broadcast %310 : vector<8x1xf32> to vector<8x32xf32>
    %319 = arith.subf %304, %318 : vector<8x32xf32>
    %cst_96 = arith.constant 9.99999996E-13 : f32
    %320 = vector.broadcast %cst_96 : f32 to vector<8x1xf32>
    %321 = arith.addf %317, %320 : vector<8x1xf32>
    %322 = math.rsqrt %321 : vector<8x1xf32>
    %323 = vector.broadcast %322 : vector<8x1xf32> to vector<8x32xf32>
    %324 = arith.mulf %319, %323 : vector<8x32xf32>
    %325 = vector.broadcast %305 : vector<1x32xf32> to vector<8x32xf32>
    %326 = arith.mulf %324, %325 : vector<8x32xf32>
    %327 = vector.broadcast %306 : vector<1x32xf32> to vector<8x32xf32>
    %328 = arith.addf %326, %327 : vector<8x32xf32>
    %c2_97 = arith.constant 2 : index
    %c0_98 = arith.constant 0 : index
    %c0_99 = arith.constant 0 : index
    %329 = vector.load %arg6[%c2_97, %c0_98, %c0_99] : memref<3x32x128xbf16, #tpu.memory_space<vmem>>, vector<1x32x128xbf16>
    %330 = vector.shape_cast %329 : vector<1x32x128xbf16> to vector<32x128xbf16>
    %331 = arith.truncf %328 : vector<8x32xf32> to vector<8x32xbf16>
    %cst_100 = arith.constant dense<0.000000e+00> : vector<8x128xf32>
    %332 = tpu.matmul %331, %330, %cst_100 {dimension_numbers = #tpu.dot_dimension_numbers<[1], [0], [0], [1], [0, 0, 1, 1], [], []>} : vector<8x32xbf16>, vector<32x128xbf16>, vector<8x128xf32> -> vector<8x128xf32>
    %c18 = arith.constant 18 : index
    %c0_101 = arith.constant 0 : index
    %333 = vector.load %arg5[%c18, %c0_101] : memref<19x128xf32, #tpu.memory_space<vmem>>, vector<1x128xf32>
    %334 = vector.broadcast %333 : vector<1x128xf32> to vector<8x128xf32>
    %335 = arith.addf %332, %334 : vector<8x128xf32>
    %336 = vector.shape_cast %335 : vector<8x128xf32> to vector<1x8x128xf32>
    %337 = arith.truncf %336 : vector<1x8x128xf32> to vector<1x8x128xbf16>
    %c0_102 = arith.constant 0 : index
    %c0_103 = arith.constant 0 : index
    %c0_104 = arith.constant 0 : index
    %338 = vector.load %arg9[%c0_102, %c0_103, %c0_104] : memref<1x8x128xbf16, #tpu.memory_space<vmem>>, vector<1x8x128xbf16>
    tpu.vector_store %arg9[%c0_102, %c0_103, %c0_104], %337 {strides = array<i32>} : memref<1x8x128xbf16, #tpu.memory_space<vmem>>, vector<1x8x128xbf16>,
    return
  }
  func.func @transform_0(%arg0: i32) -> (i32, i32, i32) {
    %c0_i32 = arith.constant 0 : i32
    %c0_i32_0 = arith.constant 0 : i32
    %c0_i32_1 = arith.constant 0 : i32
    return %arg0, %c0_i32, %c0_i32_0 : i32, i32, i32
  }
  func.func @transform_1(%arg0: i32) -> (i32, i32, i32) {
    %c0_i32 = arith.constant 0 : i32
    %c0_i32_0 = arith.constant 0 : i32
    %c0_i32_1 = arith.constant 0 : i32
    return %arg0, %c0_i32, %c0_i32_0 : i32, i32, i32
  }
  func.func @transform_2(%arg0: i32) -> (i32, i32) {
    %c0_i32 = arith.constant 0 : i32
    %c0_i32_0 = arith.constant 0 : i32
    %c0_i32_1 = arith.constant 0 : i32
    return %c0_i32, %c0_i32_0 : i32, i32
  }
  func.func @transform_3(%arg0: i32) -> (i32, i32) {
    %c0_i32 = arith.constant 0 : i32
    %c0_i32_0 = arith.constant 0 : i32
    %c0_i32_1 = arith.constant 0 : i32
    return %c0_i32, %c0_i32_0 : i32, i32
  }
  func.func @transform_4(%arg0: i32) -> (i32, i32) {
    %c0_i32 = arith.constant 0 : i32
    %c0_i32_0 = arith.constant 0 : i32
    %c0_i32_1 = arith.constant 0 : i32
    return %c0_i32, %c0_i32_0 : i32, i32
  }
  func.func @transform_5(%arg0: i32) -> (i32, i32, i32) {
    %c0_i32 = arith.constant 0 : i32
    %c0_i32_0 = arith.constant 0 : i32
    %c0_i32_1 = arith.constant 0 : i32
    %c0_i32_2 = arith.constant 0 : i32
    return %c0_i32, %c0_i32_0, %c0_i32_1 : i32, i32, i32
  }
  func.func @transform_6(%arg0: i32) -> (i32, i32, i32) {
    %c0_i32 = arith.constant 0 : i32
    %c0_i32_0 = arith.constant 0 : i32
    %c0_i32_1 = arith.constant 0 : i32
    %c0_i32_2 = arith.constant 0 : i32
    return %c0_i32, %c0_i32_0, %c0_i32_1 : i32, i32, i32
  }
  func.func @transform_7(%arg0: i32) -> (i32, i32, i32) {
    %c0_i32 = arith.constant 0 : i32
    %c0_i32_0 = arith.constant 0 : i32
    %c0_i32_1 = arith.constant 0 : i32
    %c0_i32_2 = arith.constant 0 : i32
    return %c0_i32, %c0_i32_0, %c0_i32_1 : i32, i32, i32
  }
  func.func @transform_8(%arg0: i32) -> (i32, i32, i32) {
    %c0_i32 = arith.constant 0 : i32
    %c0_i32_0 = arith.constant 0 : i32
    %c0_i32_1 = arith.constant 0 : i32
    return %arg0, %c0_i32, %c0_i32_0 : i32, i32, i32
  }
}

</mosaic_0001>

<bundles_post_ra>
// kernel: torch_model_forward.1
= control target key start
LH: loop header
LB: loop body
LE: loop exit
PB: predicated region body
PF: predicated region fallthrough
CT: control target
= control target key end

     0   :  { %13 = vsyncpa [#allocation3], 0  ;;  %s2458_s0 = inlined_call_operand.vmem [shape: s32[2,8,1], index: 0, kind: input, shape index: {}]   ;;  %s2459_s1 = inlined_call_operand.vmem [shape: s32[2,1,8], index: 1, kind: input, shape index: {}]   ;;  %s2460_s2 = inlined_call_operand.vmem [shape: bf16[30,32], index: 2, kind: input, shape index: {}]   ;;  %s2461_s3 = inlined_call_operand.hbm [shape: f32[64,32], index: 3, kind: input, shape index: {}]   ;;  %s2462_s4 = inlined_call_operand.hbm [shape: f32[19,128], index: 4, kind: input, shape index: {}]   ;;  %s2463_s5 = inlined_call_operand.hbm [shape: bf16[3,32,128], index: 5, kind: input, shape index: {}]   ;;  %s2464_s6 = inlined_call_operand.hbm [shape: bf16[2,32,64], index: 6, kind: input, shape index: {}]   ;;  %s2465_s7 = inlined_call_operand.hbm [shape: bf16[2,64,32], index: 7, kind: input, shape index: {}]   ;;  %s2466_s8 = inlined_call_operand.vmem [shape: bf16[2,8,128], index: 8, kind: output, shape index: {}]  }
   0x1   :  { %14 = vsyncpa [#allocation5], 0 }
   0x2   :  { %15 = vsyncpa [#allocation8], 0  ;;  %s2181_s27 = smov 0  }
   0x3 LB: > { %s2187_s28 = sadd.s32 4294967295, %s2113_s27   ;;  %p1656_p0 = scmp.ge.s32.totalorder %s2113_s27, 1  ;;  %s2113_s27 = sphi %s2181_s27, %s21_s27  }
   0x4   : > { %p230_p1 = scmp.lt.s32.totalorder %s2113_s27, 3  ;;  %p1838_p2 = scmp.eq.s32.totalorder %s2187_s28, 0 }
   0x5   : > { %s258_s9 = sshll.u32 %s2462_s4, 4  ;;  %s2115_s11 = smov [#allocation4]   ;;  %s259_s9 = int_to_ptr.hbm [resolvable:$true] %s258_s9 }
   0x6   : > { %p2195_p3 = pnand %p1656_p0, %p230_p1  ;;  %s260_s12 = sshll.u32 %s2115_s11, 4  ;;  %s261_s12 = int_to_ptr.vmem [resolvable:$true] %s260_s12 }
   0x7   : > { %s286_s16 = sshll.u32 %s2464_s6, 4  ;;  %s2116_s17 = smov [#allocation7]   ;;  %s287_s16 = int_to_ptr.hbm [resolvable:$true] %s286_s16 }
   0x8   : > { %p1822_p4 = pneg %p2195_p3  ;;  %s288_s18 = sshll.u32 %s2116_s17, 4  ;;  %s289_s18 = int_to_ptr.vmem [resolvable:$true] %s288_s18 }
   0x9   : > { %s2117_s19 = smov 128   ;;  %s2118_s20 = smov 8  }
   0xa   : > { %p2203_p5 = pnand %p1838_p2, %p1822_p4  ;;  %s244_s23 = sshll.u32 %s2461_s3, 4  ;;  %s245_s23 = int_to_ptr.hbm [resolvable:$true] %s244_s23 }
   0xb   : > { %s2119_s24 = smov 64   ;;  %s2120_s25 = smov 4  }
   0xc   : > { %1828 = dma.hbm_to_vmem [thread:$0]  (!%p2203_p5), %s259_s9, 384, %s261_s12, [#allocation5], %s2117_s19, %s2117_s19, %s2118_s20  }
   0xd   : > { %1834 = dma.hbm_to_vmem [thread:$0]  (!%p2203_p5), %s287_s16, 512, %s289_s18, [#allocation8], %s2119_s24, %s2119_s24, %s2120_s25  }
   0xe   : > { %s2121_s26 = smov [#allocation2]   ;;  %s272_s14 = sshll.u32 %s2463_s5, 4  ;;  %s273_s14 = int_to_ptr.hbm [resolvable:$true] %s272_s14 }
   0xf   : > { %s246_s29 = sshll.u32 %s2121_s26, 4  ;;  %s300_s15 = sshll.u32 %s2465_s7, 4  ;;  %s247_s29 = int_to_ptr.vmem [resolvable:$true] %s246_s29  ;;  %s301_s15 = int_to_ptr.hbm [resolvable:$true] %s300_s15 }
  0x10   : > { %1825 = dma.hbm_to_vmem [thread:$0]  (!%p2203_p5), %s245_s23, 1024, %s247_s29, [#allocation3], %s2117_s19, %s2117_s19, %s2118_s20  }
  0x11   : > { %s2122_s17 = smov [#allocation6]   ;;  %s2123_s16 = smov [#allocation9]  }
  0x12   : > { %s274_s21 = sshll.u32 %s2122_s17, 4  ;;  %s302_s18 = sshll.u32 %s2123_s16, 4  ;;  %s275_s21 = int_to_ptr.vmem [resolvable:$true] %s274_s21  ;;  %s303_s18 = int_to_ptr.vmem [resolvable:$true] %s302_s18 }
  0x13   : > { %1831 = dma.hbm_to_vmem [thread:$0]  (!%p2203_p5), %s273_s14, 768, %s275_s21, [#allocation5], %s2119_s24, %s2119_s24, %s2120_s25  }
  0x14   : > { %1837 = dma.hbm_to_vmem [thread:$0]  (!%p2203_p5), %s301_s15, 1024, %s303_s18, [#allocation8], %s2119_s24, %s2119_s24, %s2120_s25  }
  0x15   : > { %331 = sbr.rel (%p2195_p3) target bundleno = 4729 (0x1279), region = 52 }
  0x1a   : > { %2100 = dma.done.wait (%p1838_p2), [#allocation3], 1024  }
  0x1b   : > { %2102 = vsyncadd (%p1838_p2), [#allocation3], 4294966272 }
  0x1c   : > { %2104 = dma.done.wait (%p1838_p2), [#allocation5], 1152  }
  0x1d   : > { %2106 = vsyncadd (%p1838_p2), [#allocation5], 4294966144 }
  0x1e   : > { %2108 = dma.done.wait (%p1838_p2), [#allocation8], 1536  }
  0x1f   : > { %2110 = vsyncadd (%p1838_p2), [#allocation8], 4294965760  ;;  %p387_p6 = scmp.lt.s32.totalorder %s2187_s28, 1  ;;  %v2124_v0 = vmov 0   ;;  %v1678_v2 = vld [vmem:[%s2460_s2 + $0x8] sm:$0xf]  ;;  %v400_v7 = vlaneseq }
  0x20   : > { %1877 = vset.pattern.permute.xlu0 %v2124_v0  ;;  %vm428_vm0 = vcmask 1046528   ;;  %v1783_v3 = vld [vmem:[%s2460_s2 + $0x8] sm:$0x70]  ;;  %v1782_v6 = vld [vmem:[%s2460_s2] sm:$0xff]  ;;  %v2125_v10 = vmov 0.0   ;;  %vm424_vm2 = vcmask 244736  }
  0x21   : > { %s2470_s28 = smov (!%p387_p6, %s2187_s28), 1  ;;  %v1679_v4 = vor.u32 %v1783_v3, %v1678_v2  ;;  %v401_v8 = vand.u32 127, %v400_v7  ;;  %v445_v13 = vld [vmem:[#allocation2] sm:$0xff]  ;;  %vm449_vm3 = vcmask 261120   ;;  %v2126_v18 = vmov 32.0   ;;  %v2268_v31 = vld [vmem:[#allocation6] sm:$0xff] }
  0x22   : > { %s1669_s10 = sshll.u32 %s2470_s28, 3  ;;  %1897 = vrcp.f32 %v2126_v18  ;;  %v2265_v30 = vld [vmem:[#allocation6 + $0x8] sm:$0xff]  ;;  %s2127_s30 = smov 112   ;;  %vm534_vm8 = vcmask 64512   ;;  %vm687_vm9 = vcmask 1043456   ;;  %vm780_vm10 = vcmask 130048  }
  0x23   : > { %s390_s20 = scalar_lea.vmem %s2458_s0, %s1669_s10  ;;  %v430_v5 = vsel %vm428_vm0, %v1679_v4, 0  ;;  %515 = vmatpush.bf16.msra.mxu1 %v2265_v30  ;;  %v1878_v41 = vld [vmem:[#allocation4] ss:$0 sm:$0xff]  ;;  %v1879_v44 = vld [vmem:[#allocation4 + $0x1] ss:$0 sm:$0xff]  ;;  %s2128_s11 = smov 120  }
  0x24   : > { %v399_v1 = vld [vmem:[%s390_s20] sm:$0xff]  ;;  %438 = vmatpush.bf16.msra.mxu0 %v430_v5  ;;  %s2129_s14 = smov 104   ;;  %s2130_s9 = smov 96   ;;  %vm782_vm11 = vcmask 195584  }
  0x25   : > { %403 = vperm.xlu0 %1877, %v399_v1   ;;  %v1880_v48 = vld [vmem:[#allocation4 + $0x2] ss:$0 sm:$0xff]  ;;  %s393_s17 = scalar_lea.vmem %s2459_s1, %s2470_s28  ;;  %s2131_s21 = smov 64  }
  0x26   : > { %s2132_s16 = smov 32   ;;  %s2133_s18 = smov 16  }
  0x27   : > { %516 = vmatpush.bf16.msra.mxu1 %v2268_v31  ;;  %s2134_s10 = smov 8   ;;  %s2135_s13 = smov 24  }
  0x28   : > { %439 = vmatpush.bf16.msra.mxu0 %v1782_v6  ;;  %v1898_v19 = vpop.eup %1897  ;;  %s1670_s19 = sshll.u32 %s2470_s28, 2 }
  0x29   : > { %v454_v20 = vmul.f32 32.0, %v1898_v19  ;;  %vm458_vm4 = vweird.f32 %v1898_v19  ;;  %s397_s23 = scalar_lea.vmem %s2466_s8, %s1670_s19 }
  0x2b   : > { %v455_v21 = vsub.f32 1.0, %v454_v20 }
  0x2d   : > { %v456_v22 = vmul.f32 %v1898_v19, %v455_v21 }
  0x2f   : > { %v457_v23 = vadd.f32 %v1898_v19, %v456_v22 }
  0x31   : > { %v2261_v24 = vsel %vm458_vm4, %v1898_v19, %v457_v23  ;;  %vm952_vm4 = vcmask 523264  }
  0x97   : > { %v404_v9 = vpop.permute.xlu0 %403 }
  0x98   : > { %vm405_vm1 = vcmp.eq.s32.totalorder %v404_v9, %v401_v8 }
  0x99   : > { %v1671_v11 = vsel %vm405_vm1, 1.0, %v2125_v10  ;;  %v483_v10 = vld [vmem:[%s393_s17] sm:$0x1] }
  0x9a   : > { %v408_v12 = vpack.c.bf16 %v1671_v11, %v1671_v11  ;;  %v484_v11 = vcvt.s32.f32 %v483_v10 }
  0x9c   : > { %1680 = vmatmul.msk.bf16.vlgmr.msra.gmra.mxu0 %vm424_vm2, %v408_v12  ;;  %v485_v12 = vsub.f32 1.0, %v484_v11 }
 0x119   : > { %v441_v14 = vpop.f32.mrf.mxu0 }
 0x11a   : > { %v446_v15 = vadd.f32 %v445_v13, %v441_v14  ;;  %v486_v13 = vmul.f32 -10000.0, %v485_v12 }
 0x11c   : > { %v450_v16 = vsel %vm449_vm3, %v446_v15, 0.0 }
 0x11d   : > { %451 = vadd.xlane.f32.xlu0 %v450_v16 }
 0x121   : > { %v443_v17 = vpop.f32.mrf.mxu0 }
 0x190   : > { %v452_v25 = vpop.xlane.xlu0 %451 }
 0x191   : > { %v460_v26 = vmul.f32 %v2261_v24, %v452_v25 }
 0x193   : > { %v461_v27 = vsub.f32 %v446_v15, %v460_v26  ;;  %v2305_v15 = vperm.slane %v486_v13, 0 }
 0x195   : > { %v462_v28 = vmul.f32 %v461_v27, %v461_v27 }
 0x197   : > { %v463_v29 = vsel %vm449_vm3, %v462_v28, 0.0 }
 0x198   : > { %464 = vadd.xlane.f32.xlu1 %v463_v29 }
 0x20b   : > { %v465_v32 = vpop.xlane.xlu1 %464 }
 0x20c   : > { %v466_v33 = vmul.f32 %v465_v32, %v2261_v24 }
 0x20e   : > { %v467_v34 = vadd.f32 1e-12, %v466_v33 }
 0x210   : > { %1899 = vrsqrt.f32 %v467_v34  ;;  %vm474_vm6 = vweird.f32 %v467_v34 }
 0x216   : > { %v1900_v35 = vpop.eup %1899 }
 0x217   : > { %v469_v36 = vmul.f32 %v1900_v35, %v467_v34  ;;  %vm475_vm5 = vweird.f32 %v1900_v35 }
 0x218   : > { %vm476_vm7 = vmor %vm474_vm6, %vm475_vm5 }
 0x219   : > { %v470_v37 = vmul.f32 %v1900_v35, %v469_v36 }
 0x21b   : > { %v471_v38 = vmul.f32 0.5, %v470_v37 }
 0x21d   : > { %v472_v39 = vsub.f32 1.5, %v471_v38 }
 0x21f   : > { %v473_v40 = vmul.f32 %v1900_v35, %v472_v39 }
 0x221   : > { %v477_v42 = vsel %vm476_vm7, %v1900_v35, %v473_v40 }
 0x222   : > { %v478_v43 = vmul.f32 %v477_v42, %v461_v27 }
 0x224   : > { %v480_v45 = vmul.f32 %v1878_v41, %v478_v43 }
 0x226   : > { %v2272_v46 = vadd.f32 %v1879_v44, %v480_v45 }
 0x228   : > { %v491_v47 = vpack.c.bf16 %v2272_v46, %v2272_v46 }
 0x22a   : > { %1689 = vmatmul.msk.bf16.vlgmr.msra.gmra.mxu1 %vm449_vm3, %v491_v47 }
 0x2a7   : > { %v518_v49 = vpop.f32.mrf.mxu1 }
 0x2a8   : > { %v519_v50 = vadd.f32 %v1880_v48, %v518_v49 }
 0x2aa   : > { %v522_v51 = vpack.c.bf16 %v519_v50, %v519_v50 }
 0x2ac   : > { %526 = vrot.lane.b32.xlu2 %v522_v51, %s2127_s30  ;;  %524 = vrot.lane.b32.xlu1 %v522_v51, %s2128_s11  ;;  %v530_v52 = vunpack.c.l.b16 %v522_v51 }
 0x2ae   : > { %v2279_v54 = vpack.c.b16 %v530_v52, %v530_v52 }
 0x2af   : > { %v520_v53 = vpop.f32.mrf.mxu1 }
 0x2b4   : > { %528 = vrot.lane.b32.xlu2 %v522_v51, %s2129_s14  ;;  %532 = vrot.lane.b32.xlu1 %v2279_v54, %s2130_s9 }
 0x306   : > { %v527_v57 = vpop.permute.xlu2 %526 }
 0x307   : > { %v577_v59 = vunpack.c.l.b16 %v527_v57 }
 0x309   : > { %v578_v62 = vpack.c.b16 %v577_v59, %v577_v59 }
 0x30e   : > { %v529_v63 = vpop.permute.xlu2 %528 }
 0x30f   : > { %v600_v0 = vunpack.c.l.b16 %v529_v63 }
 0x311   : > { %v2291_v1 = vpack.c.b16 %v600_v0, %v600_v0 }
 0x31e   : > { %v525_v55 = vpop.permute.xlu1 %524 }
 0x31f   : > { %v554_v56 = vunpack.c.l.b16 %v525_v55 }
 0x321   : > { %v2284_v58 = vpack.c.b16 %v554_v56, %v554_v56 }
 0x323   : > { %556 = vrot.lane.b32.xlu2 %v2284_v58, %s2130_s9 }
 0x326   : > { %v533_v60 = vpop.permute.xlu1 %532 }
 0x327   : > { %v539_v61 = vsel %vm534_vm8, %v533_v60, 0 }
 0x328   : > { %548 = vmatpush.bf16.xpose.msra.mxu2 %v539_v61 }
 0x32b   : > { %579 = vrot.lane.b32.xlu2 %v578_v62, %s2130_s9 }
 0x32f   : > { %1690 = vmatmul.msk.bf16.vlgmr.msra.gmra.mxu2 %vm534_vm8, %v522_v51 }
 0x333   : > { %602 = vrot.lane.b32.xlu2 %v2291_v1, %s2130_s9 }
 0x37d   : > { %v557_v2 = vpop.permute.xlu2 %556 }
 0x37e   : > { %v562_v3 = vsel %vm534_vm8, %v557_v2, 0 }
 0x37f   : > { %571 = vmatpush.bf16.xpose.msra.mxu3 %v562_v3 }
 0x385   : > { %v580_v4 = vpop.permute.xlu2 %579 }
 0x386   : > { %1691 = vmatmul.msk.bf16.vlgmr.msra.gmra.mxu3 %vm534_vm8, %v525_v55  ;;  %v585_v5 = vsel %vm534_vm8, %v580_v4, 0 }
 0x387   : > { %594 = vmatpush.bf16.xpose.msrb.mxu0 %v585_v5 }
 0x38d   : > { %v603_v6 = vpop.permute.xlu2 %602 }
 0x38e   : > { %1692 = vmatmul.msk.bf16.vlgmr.msrb.gmra.mxu0 %vm534_vm8, %v527_v57  ;;  %v608_v7 = vsel %vm534_vm8, %v603_v6, 0 }
 0x38f   : > { %617 = vmatpush.bf16.xpose.msrb.mxu1 %v608_v7 }
 0x396   : > { %1693 = vmatmul.msk.bf16.vlgmr.msrb.gmra.mxu1 %vm534_vm8, %v529_v63 }
 0x3b2   : > { %v550_v8 = vpop.f32.mrf.mxu2 }
 0x3b3   : > { %v623_v29 = vmul.f32 0.35355338, %v550_v8 }
 0x3b5   : > { %v630_v34 = vadd.f32 %v2305_v15, %v623_v29 }
 0x3b7   : > { %v634_v35 = vsel %vm534_vm8, %v630_v34, -inf }
 0x3ba   : > { %v552_v9 = vpop.f32.mrf.mxu2 }
 0x409   : > { %v573_v14 = vpop.f32.mrf.mxu3 }
 0x40a   : > { %v624_v16 = vmul.f32 0.35355338, %v573_v14 }
 0x40b   : > { %v596_v17 = vpop.f32.mrf.mxu0 }
 0x40c   : > { %v625_v18 = vmul.f32 0.35355338, %v596_v17  ;;  %v631_v19 = vadd.f32 %v2305_v15, %v624_v16 }
 0x40e   : > { %v637_v20 = vsel %vm534_vm8, %v631_v19, -inf  ;;  %v632_v21 = vadd.f32 %v2305_v15, %v625_v18 }
 0x40f   : > { %638 = vmax.xlane.f32.xlu2 %v637_v20 }
 0x410   : > { %v640_v22 = vsel %vm534_vm8, %v632_v21, -inf }
 0x411   : > { %v575_v23 = vpop.f32.mrf.mxu3  ;;  %641 = vmax.xlane.f32.xlu1 %v640_v22 }
 0x413   : > { %v598_v25 = vpop.f32.mrf.mxu0  ;;  %v619_v26 = vpop.f32.mrf.mxu1 }
 0x414   : > { %v626_v27 = vmul.f32 0.35355338, %v619_v26 }
 0x416   : > { %v633_v28 = vadd.f32 %v2305_v15, %v626_v27 }
 0x418   : > { %v643_v32 = vsel %vm534_vm8, %v633_v28, -inf }
 0x419   : > { %644 = vmax.xlane.f32.xlu0 %v643_v32 }
 0x41b   : > { %v621_v33 = vpop.f32.mrf.mxu1 }
 0x421   : > { %635 = vmax.xlane.f32.xlu0 %v634_v35 }
 0x42a   : > { %725 = vrot.lane.b32.xlu1 %v578_v62, %s2131_s21 }
 0x432   : > { %682 = vrot.lane.b32.xlu1 %v2279_v54, %s2131_s21 }
 0x482   : > { %v639_v36 = vpop.xlane.xlu2 %638 }
 0x483   : > { %v647_v39 = vsub.f32 %v631_v19, %v639_v36  ;;  %v1881_v36 = vld [vmem:[#allocation4 + $0x3] ss:$0 sm:$0xff] }
 0x484   : > { %v642_v37 = vpop.xlane.xlu1 %641 }
 0x485   : > { %v648_v38 = vsub.f32 %v632_v21, %v642_v37  ;;  %v652_v41 = vmul.f32 1.442695, %v647_v39 }
 0x487   : > { %v654_v40 = vmul.f32 1.442695, %v648_v38 }
 0x489   : > { %1901 = vpow2.f32 %v654_v40 }
 0x48a   : > { %1903 = vpow2.f32 %v652_v41 }
 0x48c   : > { %v645_v42 = vpop.xlane.xlu0 %644 }
 0x48d   : > { %v649_v43 = vsub.f32 %v633_v28, %v645_v42 }
 0x48f   : > { %v1902_v44 = vpop.eup %1901  ;;  %v656_v45 = vmul.f32 1.442695, %v649_v43 }
 0x490   : > { %v664_v47 = vsel %vm534_vm8, %v1902_v44, 0.0  ;;  %v1904_v48 = vpop.eup %1903 }
 0x491   : > { %1905 = vpow2.f32 %v656_v45  ;;  %665 = vadd.xlane.f32.xlu0 %v664_v47  ;;  %v661_v51 = vsel %vm534_vm8, %v1904_v48, 0.0 }
 0x494   : > { %v636_v56 = vpop.xlane.xlu0 %635 }
 0x495   : > { %v646_v57 = vsub.f32 %v630_v34, %v636_v56 }
 0x497   : > { %v1906_v49 = vpop.eup %1905  ;;  %v650_v59 = vmul.f32 1.442695, %v646_v57 }
 0x498   : > { %v667_v50 = vsel %vm534_vm8, %v1906_v49, 0.0 }
 0x499   : > { %668 = vadd.xlane.f32.xlu2 %v667_v50  ;;  %662 = vadd.xlane.f32.xlu0 %v661_v51  ;;  %1907 = vpow2.f32 %v650_v59  ;;  %v1882_v59 = vld [vmem:[#allocation4 + $0x4] ss:$0 sm:$0xff] }
 0x49c   : > { %v726_v52 = vpop.permute.xlu1 %725 }
 0x49d   : > { %v731_v53 = vsel %vm687_vm9, %v726_v52, 0 }
 0x49e   : > { %740 = vmatpush.bf16.msra.mxu0 %v731_v53 }
 0x49f   : > { %v1908_v60 = vpop.eup %1907 }
 0x4a0   : > { %v658_v61 = vsel %vm534_vm8, %v1908_v60, 0.0 }
 0x4a4   : > { %v683_v54 = vpop.permute.xlu1 %682 }
 0x4a5   : > { %v689_v55 = vsel %vm687_vm9, %v683_v54, 0 }
 0x4a6   : > { %698 = vmatpush.bf16.msrb.mxu2 %v689_v55 }
 0x4ad   : > { %704 = vrot.lane.b32.xlu0 %v2284_v58, %s2131_s21 }
 0x4b1   : > { %746 = vrot.lane.b32.xlu2 %v2291_v1, %s2131_s21 }
 0x4b9   : > { %789 = vrot.lane.b32.xlu2 %v2265_v30, %s2132_s16 }
 0x4d7   : > { %659 = vadd.xlane.f32.xlu0 %v658_v61  ;;  %v1883_v61 = vld [vmem:[#allocation4 + $0x5] ss:$0 sm:$0xff] }
 0x504   : > { %v666_v62 = vpop.xlane.xlu0 %665 }
 0x505   : > { %1909 = vrcp.f32 %v666_v62 }
 0x50b   : > { %v1910_v63 = vpop.eup %1909 }
 0x50c   : > { %v676_v0 = vmul.f32 %v1910_v63, %v1902_v44  ;;  %v669_v58 = vpop.xlane.xlu2 %668  ;;  %v663_v1 = vpop.xlane.xlu0 %662 }
 0x50d   : > { %1911 = vrcp.f32 %v669_v58 }
 0x50e   : > { %v680_v2 = vpack.c.bf16 %v676_v0, %v676_v0  ;;  %1913 = vrcp.f32 %v663_v1 }
 0x510   : > { %1696 = vmatmul.msk.bf16.vlgmr.msra.gmra.mxu0 %vm534_vm8, %v680_v2  ;;  %v1884_v2 = vld [vmem:[#allocation4 + $0x6] ss:$0 sm:$0xff] }
 0x513   : > { %v1912_v3 = vpop.eup %1911 }
 0x514   : > { %v677_v4 = vmul.f32 %v1912_v3, %v1906_v49  ;;  %v747_v5 = vpop.permute.xlu2 %746  ;;  %v1914_v30 = vpop.eup %1913  ;;  %v1786_v49 = vld [vmem:[#allocation7] sm:$0xff] }
 0x515   : > { %v752_v6 = vsel %vm687_vm9, %v747_v5, 0  ;;  %v675_v8 = vmul.f32 %v1914_v30, %v1904_v48  ;;  %v1787_v48 = vld [vmem:[#allocation7 + $0x8] sm:$0xff]  ;;  %v1791_v30 = vld [vmem:[#allocation9 + $0x18] sm:$0xff] }
 0x516   : > { %v681_v7 = vpack.c.bf16 %v677_v4, %v677_v4  ;;  %761 = vmatpush.bf16.msra.mxu1 %v752_v6  ;;  %960 = vmatpush.bf16.msrb.mxu0 %v1791_v30 }
 0x517   : > { %v679_v11 = vpack.c.bf16 %v675_v8, %v675_v8 }
 0x519   : > { %1697 = vmatmul.msk.bf16.vlgmr.msra.gmra.mxu1 %vm534_vm8, %v681_v7 }
 0x51c   : > { %v790_v23 = vpop.permute.xlu2 %789 }
 0x51d   : > { %802 = vmatpush.bf16.msra.mxu2 %v790_v23 }
 0x51f   : > { %v705_v9 = vpop.permute.xlu0 %704 }
 0x520   : > { %v710_v10 = vsel %vm687_vm9, %v705_v9, 0 }
 0x521   : > { %719 = vmatpush.bf16.msrb.mxu3 %v710_v10 }
 0x524   : > { %1695 = vmatmul.msk.bf16.vlgmr.msrb.gmra.mxu3 %vm534_vm8, %v679_v11 }
 0x525   : > { %866 = vmatpush.bf16.msra.mxu3 %v1787_v48 }
 0x529   : > { %867 = vmatpush.bf16.msra.mxu3 %v1786_v49 }
 0x54a   : > { %v660_v12 = vpop.xlane.xlu0 %659 }
 0x54b   : > { %1915 = vrcp.f32 %v660_v12  ;;  %v1790_v12 = vld [vmem:[#allocation9 + $0x10] sm:$0xff] }
 0x54c   : > { %961 = vmatpush.bf16.msrb.mxu0 %v1790_v12 }
 0x551   : > { %v1916_v13 = vpop.eup %1915 }
 0x552   : > { %v674_v14 = vmul.f32 %v1916_v13, %v1908_v60 }
 0x554   : > { %v678_v16 = vpack.c.bf16 %v674_v14, %v674_v14 }
 0x556   : > { %1694 = vmatmul.msk.bf16.vlgmr.msrb.gmra.mxu2 %vm534_vm8, %v678_v16 }
 0x58d   : > { %v742_v17 = vpop.f32.mrf.mxu0 }
 0x58e   : > { %772 = vrot.lane.b32.xlu2 %v742_v17, %s2133_s18 }
 0x595   : > { %v744_v18 = vpop.f32.mrf.mxu0 }
 0x596   : > { %v763_v19 = vpop.f32.mrf.mxu1  ;;  %787 = vrot.lane.b32.xlu2 %v2268_v31, %s2132_s16  ;;  %v1789_v18 = vld [vmem:[#allocation9 + $0x8] sm:$0xff] }
 0x597   : > { %962 = vmatpush.bf16.msrb.mxu0 %v1789_v18 }
 0x59e   : > { %v765_v20 = vpop.f32.mrf.mxu1 }
 0x5a7   : > { %v721_v21 = vpop.f32.mrf.mxu3 }
 0x5a8   : > { %768 = vrot.lane.b32.xlu1 %v721_v21, %s2134_s10 }
 0x5af   : > { %v723_v22 = vpop.f32.mrf.mxu3 }
 0x5b0   : > { %776 = vrot.lane.b32.xlu1 %v763_v19, %s2135_s13  ;;  %v1788_v22 = vld [vmem:[#allocation9] sm:$0xff] }
 0x5b1   : > { %963 = vmatpush.bf16.msrb.mxu0 %v1788_v22 }
 0x5d9   : > { %v700_v25 = vpop.f32.mrf.mxu2 }
 0x5e1   : > { %v702_v26 = vpop.f32.mrf.mxu2 }
 0x5e8   : > { %v773_v27 = vpop.permute.xlu2 %772 }
 0x5f0   : > { %v788_v28 = vpop.permute.xlu2 %787 }
 0x5f1   : > { %803 = vmatpush.bf16.msra.mxu2 %v788_v28 }
 0x61a   : > { %v769_v29 = vpop.permute.xlu1 %768 }
 0x61b   : > { %v779_v32 = vsel %vm534_vm8, %v700_v25, %v769_v29 }
 0x61c   : > { %v781_v33 = vsel %vm780_vm10, %v779_v32, %v773_v27 }
 0x622   : > { %v777_v31 = vpop.permute.xlu1 %776 }
 0x623   : > { %v783_v34 = vsel %vm782_vm11, %v781_v33, %v777_v31 }
 0x624   : > { %v784_v35 = vpack.c.bf16 %v783_v34, %v783_v34 }
 0x626   : > { %1698 = vmatmul.msk.bf16.vlgmr.msra.gmra.mxu2 %vm449_vm3, %v784_v35 }
 0x6a9   : > { %v805_v37 = vpop.f32.mrf.mxu2 }
 0x6aa   : > { %v806_v38 = vadd.f32 %v1881_v36, %v805_v37 }
 0x6ac   : > { %v809_v39 = vadd.f32 %v806_v38, %v2272_v46 }
 0x6ae   : > { %v812_v40 = vsel %vm449_vm3, %v809_v39, 0.0 }
 0x6af   : > { %813 = vadd.xlane.f32.xlu1 %v812_v40 }
 0x6b1   : > { %v807_v41 = vpop.f32.mrf.mxu2 }
 0x722   : > { %v814_v42 = vpop.xlane.xlu1 %813 }
 0x723   : > { %v815_v43 = vmul.f32 %v814_v42, %v2261_v24 }
 0x725   : > { %v816_v44 = vsub.f32 %v809_v39, %v815_v43 }
 0x727   : > { %v817_v45 = vmul.f32 %v816_v44, %v816_v44 }
 0x729   : > { %v818_v47 = vsel %vm449_vm3, %v817_v45, 0.0 }
 0x72a   : > { %819 = vadd.xlane.f32.xlu2 %v818_v47 }
 0x79d   : > { %v820_v50 = vpop.xlane.xlu2 %819 }
 0x79e   : > { %v821_v51 = vmul.f32 %v820_v50, %v2261_v24 }
 0x7a0   : > { %v822_v46 = vadd.f32 1e-12, %v821_v51 }
 0x7a2   : > { %1917 = vrsqrt.f32 %v822_v46  ;;  %vm829_vm13 = vweird.f32 %v822_v46 }
 0x7a8   : > { %v1918_v52 = vpop.eup %1917 }
 0x7a9   : > { %v824_v53 = vmul.f32 %v1918_v52, %v822_v46  ;;  %vm830_vm12 = vweird.f32 %v1918_v52  ;;  %v1885_v46 = vld [vmem:[#allocation4 + $0x7] ss:$0 sm:$0xff] }
 0x7aa   : > { %vm831_vm14 = vmor %vm829_vm13, %vm830_vm12 }
 0x7ab   : > { %v825_v54 = vmul.f32 %v1918_v52, %v824_v53 }
 0x7ad   : > { %v826_v55 = vmul.f32 0.5, %v825_v54 }
 0x7af   : > { %v827_v56 = vsub.f32 1.5, %v826_v55 }
 0x7b1   : > { %v828_v57 = vmul.f32 %v1918_v52, %v827_v56 }
 0x7b3   : > { %v832_v60 = vsel %vm831_vm14, %v1918_v52, %v828_v57 }
 0x7b4   : > { %v833_v62 = vmul.f32 %v832_v60, %v816_v44 }
 0x7b6   : > { %v835_v63 = vmul.f32 %v1882_v59, %v833_v62 }
 0x7b8   : > { %v2350_v0 = vadd.f32 %v1883_v61, %v835_v63  ;;  %v2360_v63 = vld [vmem:[#allocation6 + $0x18] sm:$0xff] }
 0x7b9   : > { %1027 = vmatpush.bf16.msrb.mxu1 %v2360_v63 }
 0x7ba   : > { %v842_v58 = vpack.c.bf16 %v2350_v0, %v2350_v0 }
 0x7bc   : > { %1707 = vmatmul.msk.bf16.vlgmr.msra.gmra.mxu3 %vm449_vm3, %v842_v58  ;;  %v2363_v58 = vld [vmem:[#allocation6 + $0x10] sm:$0xff] }
 0x7bd   : > { %1028 = vmatpush.bf16.msrb.mxu1 %v2363_v58 }
 0x83f   : > { %v869_v1 = vpop.f32.mrf.mxu3 }
 0x840   : > { %v870_v3 = vadd.f32 %v1884_v2, %v869_v1 }
 0x842   : > { %v874_v4 = vmul.f32 0.70710677, %v870_v3  ;;  %v873_v48 = vmul.f32 0.5, %v870_v3 }
 0x844   : > { %v875_v5 = vmul.f32 %v874_v4, %v874_v4 }
 0x846   : > { %v876_v6 = vmin.f32 %v875_v5, 16.0 }
 0x847   : > { %v871_v7 = vpop.f32.mrf.mxu3 }
 0x848   : > { %v877_v8 = vmul.f32 2.1237322e-06, %v876_v6  ;;  %v888_v9 = vmul.f32 3.8918573e-05, %v876_v6 }
 0x84a   : > { %v878_v10 = vadd.f32 0.00028619796, %v877_v8  ;;  %v889_v11 = vadd.f32 0.001143296, %v888_v9  ;;  %v1886_v8 = vld [vmem:[#allocation4 + $0x8] ss:$0 sm:$0xff] }
 0x84c   : > { %v879_v13 = vmul.f32 %v878_v10, %v876_v6  ;;  %v890_v14 = vmul.f32 %v889_v11, %v876_v6  ;;  %v1887_v10 = vld [vmem:[#allocation4 + $0x9] ss:$0 sm:$0xff] }
 0x84e   : > { %v891_v16 = vadd.f32 0.014752088, %v890_v14  ;;  %v880_v17 = vadd.f32 0.0036580483, %v879_v13 }
 0x850   : > { %v892_v19 = vmul.f32 %v891_v16, %v876_v6  ;;  %v881_v21 = vmul.f32 %v880_v17, %v876_v6  ;;  %v1888_v16 = vld [vmem:[#allocation4 + $0xa] ss:$0 sm:$0xff] }
 0x852   : > { %v893_v20 = vadd.f32 0.112945676, %v892_v19  ;;  %v882_v26 = vadd.f32 0.05243302, %v881_v21 }
 0x854   : > { %v894_v23 = vmul.f32 %v893_v20, %v876_v6  ;;  %v883_v29 = vmul.f32 %v882_v26, %v876_v6 }
 0x856   : > { %v895_v25 = vadd.f32 0.4994258, %v894_v23  ;;  %v884_v32 = vadd.f32 0.18741608, %v883_v29 }
 0x858   : > { %v896_v27 = vmul.f32 %v895_v25, %v876_v6  ;;  %v885_v33 = vmul.f32 %v884_v32, %v876_v6 }
 0x85a   : > { %v897_v28 = vadd.f32 1.0, %v896_v27  ;;  %v886_v37 = vadd.f32 1.1283791, %v885_v33 }
 0x85c   : > { %1919 = vrcp.f32 %v897_v28  ;;  %v909_v36 = vand.u32 2147483648, %v897_v28  ;;  %v907_v39 = vand.u32 2147483647, %v897_v28  ;;  %vm903_vm0 = vweird.f32 %v897_v28 }
 0x85d   : > { %v887_v42 = vmul.f32 %v886_v37, %v874_v4 }
 0x85e   : > { %v910_v41 = vor.u32 1.1754944e-38, %v909_v36  ;;  %vm908_vm2 = vcmp.eq.f32.partialorder %v907_v39, 8.507059e+37 }
 0x862   : > { %v1920_v31 = vpop.eup %1919 }
 0x863   : > { %v899_v34 = vmul.f32 %v1920_v31, %v897_v28  ;;  %vm904_vm15 = vweird.f32 %v1920_v31 }
 0x864   : > { %vm905_vm1 = vmor %vm903_vm0, %vm904_vm15 }
 0x865   : > { %v900_v35 = vsub.f32 1.0, %v899_v34 }
 0x867   : > { %v901_v38 = vmul.f32 %v1920_v31, %v900_v35 }
 0x869   : > { %v902_v40 = vadd.f32 %v1920_v31, %v901_v38 }
 0x86b   : > { %v906_v43 = vsel %vm905_vm1, %v1920_v31, %v902_v40 }
 0x86c   : > { %v911_v44 = vsel %vm908_vm2, %v910_v41, %v906_v43 }
 0x86d   : > { %v912_v45 = vmul.f32 %v911_v44, %v887_v42 }
 0x86f   : > { %v1708_v47 = vclamps-f32 %v912_v45, 1.0 }
 0x871   : > { %v915_v49 = vadd.f32 1.0, %v1708_v47 }
 0x873   : > { %v916_v50 = vmul.f32 %v915_v49, %v873_v48 }
 0x875   : > { %v925_v51 = vpack.c.bf16 %v916_v50, %v916_v50 }
 0x877   : > { %1725 = vmatmul.msk.bf16.vlgmr.msrb.gmra.mxu0 %vm952_vm4, %v925_v51 }
 0x8f4   : > { %v965_v52 = vpop.f32.mrf.mxu0 }
 0x8f5   : > { %v966_v53 = vadd.f32 %v1885_v46, %v965_v52 }
 0x8f7   : > { %v969_v54 = vadd.f32 %v966_v53, %v2350_v0 }
 0x8f9   : > { %v972_v55 = vsel %vm449_vm3, %v969_v54, 0.0 }
 0x8fa   : > { %973 = vadd.xlane.f32.xlu0 %v972_v55 }
 0x8fc   : > { %v967_v56 = vpop.f32.mrf.mxu0 }
 0x96d   : > { %v974_v57 = vpop.xlane.xlu0 %973 }
 0x96e   : > { %v975_v59 = vmul.f32 %v974_v57, %v2261_v24 }
 0x970   : > { %v976_v60 = vsub.f32 %v969_v54, %v975_v59 }
 0x972   : > { %v977_v61 = vmul.f32 %v976_v60, %v976_v60 }
 0x974   : > { %v978_v62 = vsel %vm449_vm3, %v977_v61, 0.0 }
 0x975   : > { %979 = vadd.xlane.f32.xlu0 %v978_v62 }
 0x9e8   : > { %v980_v0 = vpop.xlane.xlu0 %979 }
 0x9e9   : > { %v981_v2 = vmul.f32 %v980_v0, %v2261_v24 }
 0x9eb   : > { %v982_v1 = vadd.f32 1e-12, %v981_v2 }
 0x9ed   : > { %1921 = vrsqrt.f32 %v982_v1  ;;  %vm989_vm6 = vweird.f32 %v982_v1 }
 0x9f3   : > { %v1922_v3 = vpop.eup %1921 }
 0x9f4   : > { %v984_v4 = vmul.f32 %v1922_v3, %v982_v1  ;;  %vm990_vm5 = vweird.f32 %v1922_v3 }
 0x9f5   : > { %vm991_vm7 = vmor %vm989_vm6, %vm990_vm5 }
 0x9f6   : > { %v985_v5 = vmul.f32 %v1922_v3, %v984_v4 }
 0x9f8   : > { %v986_v6 = vmul.f32 0.5, %v985_v5 }
 0x9fa   : > { %v987_v7 = vsub.f32 1.5, %v986_v6 }
 0x9fc   : > { %v988_v30 = vmul.f32 %v1922_v3, %v987_v7 }
 0x9fe   : > { %v992_v9 = vsel %vm991_vm7, %v1922_v3, %v988_v30 }
 0x9ff   : > { %v993_v11 = vmul.f32 %v992_v9, %v976_v60 }
 0xa01   : > { %v995_v12 = vmul.f32 %v1886_v8, %v993_v11 }
 0xa03   : > { %v2367_v13 = vadd.f32 %v1887_v10, %v995_v12 }
 0xa05   : > { %v1003_v14 = vpack.c.bf16 %v2367_v13, %v2367_v13 }
 0xa07   : > { %1734 = vmatmul.msk.bf16.vlgmr.msrb.gmra.mxu1 %vm449_vm3, %v1003_v14 }
 0xa84   : > { %v1030_v17 = vpop.f32.mrf.mxu1 }
 0xa85   : > { %v1031_v18 = vadd.f32 %v1888_v16, %v1030_v17 }
 0xa87   : > { %v1034_v19 = vpack.c.bf16 %v1031_v18, %v1031_v18 }
 0xa89   : > { %1040 = vrot.lane.b32.xlu2 %v1034_v19, %s2129_s14  ;;  %1038 = vrot.lane.b32.xlu1 %v1034_v19, %s2127_s30  ;;  %v1042_v20 = vunpack.c.l.b16 %v1034_v19 }
 0xa8a   : > { %1036 = vrot.lane.b32.xlu0 %v1034_v19, %s2128_s11 }
 0xa8b   : > { %v2375_v22 = vpack.c.b16 %v1042_v20, %v1042_v20 }
 0xa8c   : > { %v1032_v21 = vpop.f32.mrf.mxu1 }
 0xa91   : > { %1044 = vrot.lane.b32.xlu1 %v2375_v22, %s2130_s9 }
 0xae3   : > { %v1041_v33 = vpop.permute.xlu2 %1040 }
 0xae4   : > { %v1111_v34 = vunpack.c.l.b16 %v1041_v33 }
 0xae6   : > { %v1112_v35 = vpack.c.b16 %v1111_v34, %v1111_v34 }
 0xafb   : > { %v1039_v23 = vpop.permute.xlu1 %1038 }
 0xafc   : > { %v1037_v25 = vpop.permute.xlu0 %1036  ;;  %v1088_v28 = vunpack.c.l.b16 %v1039_v23 }
 0xafd   : > { %v1065_v26 = vunpack.c.l.b16 %v1037_v25 }
 0xafe   : > { %v2384_v31 = vpack.c.b16 %v1088_v28, %v1088_v28 }
 0xaff   : > { %v2379_v27 = vpack.c.b16 %v1065_v26, %v1065_v26 }
 0xb01   : > { %1067 = vrot.lane.b32.xlu0 %v2379_v27, %s2130_s9 }
 0xb03   : > { %v1045_v29 = vpop.permute.xlu1 %1044 }
 0xb04   : > { %v1050_v32 = vsel %vm534_vm8, %v1045_v29, 0 }
 0xb05   : > { %1059 = vmatpush.bf16.xpose.msrb.mxu2 %v1050_v32 }
 0xb09   : > { %1090 = vrot.lane.b32.xlu0 %v2384_v31, %s2130_s9 }
 0xb0c   : > { %1735 = vmatmul.msk.bf16.vlgmr.msrb.gmra.mxu2 %vm534_vm8, %v1034_v19 }
 0xb11   : > { %1113 = vrot.lane.b32.xlu0 %v1112_v35, %s2130_s9 }
 0xb73   : > { %v1068_v36 = vpop.permute.xlu0 %1067 }
 0xb74   : > { %v1073_v37 = vsel %vm534_vm8, %v1068_v36, 0 }
 0xb75   : > { %1082 = vmatpush.bf16.xpose.msrb.mxu3 %v1073_v37 }
 0xb7b   : > { %v1091_v38 = vpop.permute.xlu0 %1090 }
 0xb7c   : > { %v1096_v39 = vsel %vm534_vm8, %v1091_v38, 0  ;;  %1736 = vmatmul.msk.bf16.vlgmr.msrb.gmra.mxu3 %vm534_vm8, %v1037_v25 }
 0xb7d   : > { %1105 = vmatpush.bf16.xpose.msra.mxu0 %v1096_v39 }
 0xb83   : > { %v1114_v40 = vpop.permute.xlu0 %1113 }
 0xb84   : > { %v1119_v41 = vsel %vm534_vm8, %v1114_v40, 0  ;;  %1737 = vmatmul.msk.bf16.vlgmr.msra.gmra.mxu0 %vm534_vm8, %v1039_v23 }
 0xb85   : > { %1128 = vmatpush.bf16.xpose.msra.mxu1 %v1119_v41 }
 0xb8c   : > { %1738 = vmatmul.msk.bf16.vlgmr.msra.gmra.mxu1 %vm534_vm8, %v1041_v33 }
 0xb8f   : > { %v1061_v42 = vpop.f32.mrf.mxu2 }
 0xb90   : > { %v1134_v50 = vmul.f32 0.35355338, %v1061_v42 }
 0xb92   : > { %v1138_v54 = vadd.f32 %v1134_v50, %v2305_v15 }
 0xb94   : > { %v1142_v59 = vsel %vm534_vm8, %v1138_v54, -inf }
 0xb97   : > { %v1063_v43 = vpop.f32.mrf.mxu2 }
 0xbff   : > { %v1084_v44 = vpop.f32.mrf.mxu3 }
 0xc00   : > { %v1135_v45 = vmul.f32 0.35355338, %v1084_v44 }
 0xc01   : > { %v1107_v47 = vpop.f32.mrf.mxu0 }
 0xc02   : > { %v1136_v48 = vmul.f32 0.35355338, %v1107_v47  ;;  %v1139_v49 = vadd.f32 %v1135_v45, %v2305_v15 }
 0xc04   : > { %v1145_v51 = vsel %vm534_vm8, %v1139_v49, -inf  ;;  %v1140_v46 = vadd.f32 %v1136_v48, %v2305_v15 }
 0xc05   : > { %1146 = vmax.xlane.f32.xlu2 %v1145_v51 }
 0xc06   : > { %v1148_v52 = vsel %vm534_vm8, %v1140_v46, -inf }
 0xc07   : > { %v1086_v53 = vpop.f32.mrf.mxu3  ;;  %1149 = vmax.xlane.f32.xlu0 %v1148_v52 }
 0xc09   : > { %v1109_v55 = vpop.f32.mrf.mxu0  ;;  %v1130_v56 = vpop.f32.mrf.mxu1 }
 0xc0a   : > { %v1137_v57 = vmul.f32 0.35355338, %v1130_v56 }
 0xc0c   : > { %v1141_v60 = vadd.f32 %v1137_v57, %v2305_v15 }
 0xc0d   : > { %1143 = vmax.xlane.f32.xlu2 %v1142_v59 }
 0xc0e   : > { %v1151_v61 = vsel %vm534_vm8, %v1141_v60, -inf }
 0xc0f   : > { %1152 = vmax.xlane.f32.xlu1 %v1151_v61 }
 0xc11   : > { %v1132_v62 = vpop.f32.mrf.mxu1 }
 0xc78   : > { %v1147_v0 = vpop.xlane.xlu2 %1146 }
 0xc79   : > { %v1155_v2 = vsub.f32 %v1139_v49, %v1147_v0  ;;  %v1889_v0 = vld [vmem:[#allocation4 + $0xb] ss:$0 sm:$0xff] }
 0xc7a   : > { %v1150_v1 = vpop.xlane.xlu0 %1149 }
 0xc7b   : > { %v1160_v3 = vmul.f32 1.442695, %v1155_v2  ;;  %v1156_v4 = vsub.f32 %v1140_v46, %v1150_v1 }
 0xc7d   : > { %1923 = vpow2.f32 %v1160_v3  ;;  %v1162_v5 = vmul.f32 1.442695, %v1156_v4 }
 0xc7f   : > { %1925 = vpow2.f32 %v1162_v5 }
 0xc80   : > { %v1144_v14 = vpop.xlane.xlu2 %1143 }
 0xc81   : > { %v1154_v16 = vsub.f32 %v1138_v54, %v1144_v14 }
 0xc82   : > { %v1153_v6 = vpop.xlane.xlu1 %1152 }
 0xc83   : > { %v1924_v7 = vpop.eup %1923  ;;  %v1157_v30 = vsub.f32 %v1141_v60, %v1153_v6  ;;  %v1158_v17 = vmul.f32 1.442695, %v1154_v16 }
 0xc84   : > { %v1169_v8 = vsel %vm534_vm8, %v1924_v7, 0.0 }
 0xc85   : > { %v1926_v9 = vpop.eup %1925  ;;  %v1164_v15 = vmul.f32 1.442695, %v1157_v30  ;;  %1170 = vadd.xlane.f32.xlu0 %v1169_v8 }
 0xc86   : > { %v1172_v10 = vsel %vm534_vm8, %v1926_v9, 0.0 }
 0xc87   : > { %1927 = vpow2.f32 %v1164_v15  ;;  %1173 = vadd.xlane.f32.xlu1 %v1172_v10  ;;  %v1794_v15 = vld [vmem:[#allocation7 + $0x10] sm:$0xff] }
 0xc88   : > { %1929 = vpow2.f32 %v1158_v17 }
 0xc8d   : > { %v1928_v11 = vpop.eup %1927 }
 0xc8e   : > { %v1175_v12 = vsel %vm534_vm8, %v1928_v11, 0.0  ;;  %v1930_v18 = vpop.eup %1929 }
 0xc8f   : > { %1176 = vadd.xlane.f32.xlu2 %v1175_v12  ;;  %v1166_v19 = vsel %vm534_vm8, %v1930_v18, 0.0 }
 0xc99   : > { %1211 = vrot.lane.b32.xlu0 %v2379_v27, %s2131_s21 }
 0xca0   : > { %1232 = vrot.lane.b32.xlu1 %v2384_v31, %s2131_s21 }
 0xca7   : > { %1253 = vrot.lane.b32.xlu2 %v1112_v35, %s2131_s21 }
 0xca8   : > { %1190 = vrot.lane.b32.xlu1 %v2375_v22, %s2131_s21 }
 0xcaf   : > { %1294 = vrot.lane.b32.xlu2 %v2360_v63, %s2132_s16 }
 0xcc3   : > { %1167 = vadd.xlane.f32.xlu0 %v1166_v19 }
 0xcf8   : > { %v1171_v20 = vpop.xlane.xlu0 %1170 }
 0xcf9   : > { %1931 = vrcp.f32 %v1171_v20  ;;  %v1890_v20 = vld [vmem:[#allocation4 + $0xc] ss:$0 sm:$0xff] }
 0xcfa   : > { %v1174_v23 = vpop.xlane.xlu1 %1173 }
 0xcff   : > { %v1932_v25 = vpop.eup %1931 }
 0xd00   : > { %v1183_v22 = vmul.f32 %v1932_v25, %v1924_v7 }
 0xd02   : > { %v1177_v21 = vpop.xlane.xlu2 %1176  ;;  %v1187_v34 = vpack.c.bf16 %v1183_v22, %v1183_v22 }
 0xd03   : > { %1933 = vrcp.f32 %v1177_v21 }
 0xd04   : > { %1935 = vrcp.f32 %v1174_v23  ;;  %v1891_v23 = vld [vmem:[#allocation4 + $0xd] ss:$0 sm:$0xff] }
 0xd09   : > { %v1934_v26 = vpop.eup %1933 }
 0xd0a   : > { %v1185_v27 = vmul.f32 %v1934_v26, %v1928_v11  ;;  %v1254_v28 = vpop.permute.xlu2 %1253  ;;  %v1936_v33 = vpop.eup %1935 }
 0xd0b   : > { %v1259_v63 = vsel %vm687_vm9, %v1254_v28, 0  ;;  %v1212_v29 = vpop.permute.xlu0 %1211  ;;  %v1184_v35 = vmul.f32 %v1936_v33, %v1926_v9  ;;  %v1795_v9 = vld [vmem:[#allocation7 + $0x18] sm:$0xff]  ;;  %v1892_v28 = vld [vmem:[#allocation4 + $0xe] ss:$0 sm:$0xff] }
 0xd0c   : > { %v1189_v32 = vpack.c.bf16 %v1185_v27, %v1185_v27  ;;  %v1217_v31 = vsel %vm687_vm9, %v1212_v29, 0  ;;  %1268 = vmatpush.bf16.msrb.mxu1 %v1259_v63 }
 0xd0d   : > { %1226 = vmatpush.bf16.msra.mxu3 %v1217_v31  ;;  %v1188_v38 = vpack.c.bf16 %v1184_v35, %v1184_v35  ;;  %v1799_v35 = vld [vmem:[#allocation9 + $0x38] sm:$0xff] }
 0xd0f   : > { %1742 = vmatmul.msk.bf16.vlgmr.msrb.gmra.mxu1 %vm534_vm8, %v1189_v32 }
 0xd10   : > { %1740 = vmatmul.msk.bf16.vlgmr.msra.gmra.mxu3 %vm534_vm8, %v1187_v34 }
 0xd11   : > { %1372 = vmatpush.bf16.msrb.mxu3 %v1795_v9 }
 0xd12   : > { %v1233_v36 = vpop.permute.xlu1 %1232  ;;  %v1295_v46 = vpop.permute.xlu2 %1294 }
 0xd13   : > { %v1238_v37 = vsel %vm687_vm9, %v1233_v36, 0 }
 0xd14   : > { %1247 = vmatpush.bf16.msrb.mxu0 %v1238_v37 }
 0xd15   : > { %1373 = vmatpush.bf16.msrb.mxu3 %v1794_v15 }
 0xd17   : > { %1741 = vmatmul.msk.bf16.vlgmr.msrb.gmra.mxu0 %vm534_vm8, %v1188_v38 }
 0xd18   : > { %1466 = vmatpush.bf16.msra.mxu0 %v1799_v35  ;;  %v1894_v35 = vld [vmem:[#allocation4 + $0x10] ss:$0 sm:$0xff] }
 0xd1a   : > { %v1191_v39 = vpop.permute.xlu1 %1190 }
 0xd1b   : > { %v1196_v40 = vsel %vm687_vm9, %v1191_v39, 0 }
 0xd1c   : > { %1205 = vmatpush.bf16.msra.mxu2 %v1196_v40  ;;  %v1798_v40 = vld [vmem:[#allocation9 + $0x30] sm:$0xff] }
 0xd1d   : > { %1467 = vmatpush.bf16.msra.mxu0 %v1798_v40 }
 0xd20   : > { %1307 = vmatpush.bf16.msrb.mxu2 %v1295_v46 }
 0xd36   : > { %v1168_v41 = vpop.xlane.xlu0 %1167 }
 0xd37   : > { %1937 = vrcp.f32 %v1168_v41 }
 0xd3d   : > { %v1938_v42 = vpop.eup %1937 }
 0xd3e   : > { %v1182_v43 = vmul.f32 %v1938_v42, %v1930_v18 }
 0xd40   : > { %v1186_v44 = vpack.c.bf16 %v1182_v43, %v1182_v43 }
 0xd42   : > { %1739 = vmatmul.msk.bf16.vlgmr.msra.gmra.mxu2 %vm534_vm8, %v1186_v44 }
 0xd8c   : > { %v1270_v45 = vpop.f32.mrf.mxu1 }
 0xd93   : > { %v1228_v47 = vpop.f32.mrf.mxu3 }
 0xd94   : > { %1275 = vrot.lane.b32.xlu1 %v1228_v47, %s2134_s10  ;;  %v1249_v48 = vpop.f32.mrf.mxu0  ;;  %v1272_v49 = vpop.f32.mrf.mxu1 }
 0xd95   : > { %1279 = vrot.lane.b32.xlu2 %v1249_v48, %s2133_s18 }
 0xd9b   : > { %v1230_v50 = vpop.f32.mrf.mxu3 }
 0xd9c   : > { %1283 = vrot.lane.b32.xlu1 %v1270_v45, %s2135_s13  ;;  %v1251_v51 = vpop.f32.mrf.mxu0  ;;  %v1797_v45 = vld [vmem:[#allocation9 + $0x28] sm:$0xff]  ;;  %v1796_v50 = vld [vmem:[#allocation9 + $0x20] sm:$0xff] }
 0xd9d   : > { %1292 = vrot.lane.b32.xlu2 %v2363_v58, %s2132_s16  ;;  %1468 = vmatpush.bf16.msra.mxu0 %v1797_v45 }
 0xda1   : > { %1469 = vmatpush.bf16.msra.mxu0 %v1796_v50 }
 0xdc5   : > { %v1207_v52 = vpop.f32.mrf.mxu2 }
 0xdcd   : > { %v1209_v53 = vpop.f32.mrf.mxu2 }
 0xdef   : > { %v1280_v54 = vpop.permute.xlu2 %1279 }
 0xdf7   : > { %v1293_v55 = vpop.permute.xlu2 %1292 }
 0xdf8   : > { %1308 = vmatpush.bf16.msrb.mxu2 %v1293_v55 }
 0xe06   : > { %v1276_v56 = vpop.permute.xlu1 %1275 }
 0xe07   : > { %v1286_v57 = vsel %vm534_vm8, %v1207_v52, %v1276_v56 }
 0xe08   : > { %v1287_v59 = vsel %vm780_vm10, %v1286_v57, %v1280_v54 }
 0xe0e   : > { %v1284_v60 = vpop.permute.xlu1 %1283 }
 0xe0f   : > { %v1288_v61 = vsel %vm782_vm11, %v1287_v59, %v1284_v60 }
 0xe10   : > { %v1289_v62 = vpack.c.bf16 %v1288_v61, %v1288_v61 }
 0xe12   : > { %1743 = vmatmul.msk.bf16.vlgmr.msrb.gmra.mxu2 %vm449_vm3, %v1289_v62 }
 0xe95   : > { %v1310_v58 = vpop.f32.mrf.mxu2 }
 0xe96   : > { %v1311_v2 = vadd.f32 %v1889_v0, %v1310_v58 }
 0xe98   : > { %v1314_v1 = vadd.f32 %v1311_v2, %v2367_v13 }
 0xe9a   : > { %v1317_v3 = vsel %vm449_vm3, %v1314_v1, 0.0 }
 0xe9b   : > { %1318 = vadd.xlane.f32.xlu1 %v1317_v3 }
 0xe9d   : > { %v1312_v4 = vpop.f32.mrf.mxu2 }
 0xf0e   : > { %v1319_v5 = vpop.xlane.xlu1 %1318 }
 0xf0f   : > { %v1320_v6 = vmul.f32 %v1319_v5, %v2261_v24 }
 0xf11   : > { %v1321_v7 = vsub.f32 %v1314_v1, %v1320_v6 }
 0xf13   : > { %v1322_v30 = vmul.f32 %v1321_v7, %v1321_v7 }
 0xf15   : > { %v1323_v8 = vsel %vm449_vm3, %v1322_v30, 0.0 }
 0xf16   : > { %1324 = vadd.xlane.f32.xlu2 %v1323_v8 }
 0xf89   : > { %v1325_v10 = vpop.xlane.xlu2 %1324 }
 0xf8a   : > { %v1326_v11 = vmul.f32 %v1325_v10, %v2261_v24 }
 0xf8c   : > { %v1327_v13 = vadd.f32 1e-12, %v1326_v11  ;;  %v1893_v11 = vld [vmem:[#allocation4 + $0xf] ss:$0 sm:$0xff] }
 0xf8e   : > { %1939 = vrsqrt.f32 %v1327_v13  ;;  %vm1334_vm9 = vweird.f32 %v1327_v13 }
 0xf94   : > { %v1940_v12 = vpop.eup %1939 }
 0xf95   : > { %v1329_v14 = vmul.f32 %v1940_v12, %v1327_v13  ;;  %vm1335_vm8 = vweird.f32 %v1940_v12 }
 0xf96   : > { %vm1336_vm10 = vmor %vm1334_vm9, %vm1335_vm8 }
 0xf97   : > { %v1330_v16 = vmul.f32 %v1940_v12, %v1329_v14 }
 0xf99   : > { %v1331_v17 = vmul.f32 0.5, %v1330_v16 }
 0xf9b   : > { %v1332_v18 = vsub.f32 1.5, %v1331_v17 }
 0xf9d   : > { %v1333_v19 = vmul.f32 %v1940_v12, %v1332_v18 }
 0xf9f   : > { %v1337_v21 = vsel %vm1336_vm10, %v1940_v12, %v1333_v19 }
 0xfa0   : > { %v1338_v25 = vmul.f32 %v1337_v21, %v1321_v7 }
 0xfa2   : > { %v1340_v26 = vmul.f32 %v1890_v20, %v1338_v25  ;;  %v1801_v25 = vld [vmem:[#allocation6 + $0x28] sm:$0xff] }
 0xfa3   : > { %1533 = vmatpush.bf16.msra.mxu1 %v1801_v25 }
 0xfa4   : > { %v2439_v22 = vadd.f32 %v1891_v23, %v1340_v26  ;;  %v1800_v26 = vld [vmem:[#allocation6 + $0x20] sm:$0xff] }
 0xfa6   : > { %v1348_v27 = vpack.c.bf16 %v2439_v22, %v2439_v22 }
 0xfa7   : > { %1534 = vmatpush.bf16.msra.mxu1 %v1800_v26 }
 0xfa8   : > { %1752 = vmatmul.msk.bf16.vlgmr.msrb.gmra.mxu3 %vm449_vm3, %v1348_v27 }
0x102b   : > { %v1375_v63 = vpop.f32.mrf.mxu3 }
0x102c   : > { %v1376_v29 = vadd.f32 %v1892_v28, %v1375_v63 }
0x102e   : > { %v1380_v32 = vmul.f32 0.70710677, %v1376_v29  ;;  %v1379_v8 = vmul.f32 0.5, %v1376_v29 }
0x1030   : > { %v1381_v31 = vmul.f32 %v1380_v32, %v1380_v32 }
0x1032   : > { %v1382_v33 = vmin.f32 %v1381_v31, 16.0 }
0x1033   : > { %v1377_v34 = vpop.f32.mrf.mxu3 }
0x1034   : > { %v1383_v36 = vmul.f32 2.1237322e-06, %v1382_v33  ;;  %v1394_v37 = vmul.f32 3.8918573e-05, %v1382_v33 }
0x1036   : > { %v1384_v38 = vadd.f32 0.00028619796, %v1383_v36  ;;  %v1395_v39 = vadd.f32 0.001143296, %v1394_v37 }
0x1038   : > { %v1385_v41 = vmul.f32 %v1384_v38, %v1382_v33  ;;  %v1396_v42 = vmul.f32 %v1395_v39, %v1382_v33  ;;  %v1895_v38 = vld [vmem:[#allocation4 + $0x11] ss:$0 sm:$0xff] }
0x103a   : > { %v1397_v43 = vadd.f32 0.014752088, %v1396_v42  ;;  %v1386_v44 = vadd.f32 0.0036580483, %v1385_v41 }
0x103c   : > { %v1398_v47 = vmul.f32 %v1397_v43, %v1382_v33  ;;  %v1387_v49 = vmul.f32 %v1386_v44, %v1382_v33 }
0x103e   : > { %v1399_v48 = vadd.f32 0.112945676, %v1398_v47  ;;  %v1388_v52 = vadd.f32 0.05243302, %v1387_v49 }
0x1040   : > { %v1400_v51 = vmul.f32 %v1399_v48, %v1382_v33  ;;  %v1389_v55 = vmul.f32 %v1388_v52, %v1382_v33 }
0x1042   : > { %v1401_v46 = vadd.f32 0.4994258, %v1400_v51  ;;  %v1390_v56 = vadd.f32 0.18741608, %v1389_v55 }
0x1044   : > { %v1402_v53 = vmul.f32 %v1401_v46, %v1382_v33  ;;  %v1391_v59 = vmul.f32 %v1390_v56, %v1382_v33 }
0x1046   : > { %v1403_v54 = vadd.f32 1.0, %v1402_v53  ;;  %v1392_v0 = vadd.f32 1.1283791, %v1391_v59 }
0x1048   : > { %1941 = vrcp.f32 %v1403_v54  ;;  %v1415_v62 = vand.u32 2147483648, %v1403_v54  ;;  %v1413_v2 = vand.u32 2147483647, %v1403_v54  ;;  %vm1409_vm12 = vweird.f32 %v1403_v54 }
0x1049   : > { %v1393_v4 = vmul.f32 %v1392_v0, %v1380_v32 }
0x104a   : > { %v1416_v3 = vor.u32 1.1754944e-38, %v1415_v62  ;;  %vm1414_vm14 = vcmp.eq.f32.partialorder %v1413_v2, 8.507059e+37 }
0x104e   : > { %v1942_v57 = vpop.eup %1941 }
0x104f   : > { %v1405_v60 = vmul.f32 %v1942_v57, %v1403_v54  ;;  %vm1410_vm11 = vweird.f32 %v1942_v57 }
0x1050   : > { %vm1411_vm13 = vmor %vm1409_vm12, %vm1410_vm11 }
0x1051   : > { %v1406_v61 = vsub.f32 1.0, %v1405_v60 }
0x1053   : > { %v1407_v58 = vmul.f32 %v1942_v57, %v1406_v61 }
0x1055   : > { %v1408_v1 = vadd.f32 %v1942_v57, %v1407_v58 }
0x1057   : > { %v1412_v5 = vsel %vm1411_vm13, %v1942_v57, %v1408_v1 }
0x1058   : > { %v1417_v6 = vsel %vm1414_vm14, %v1416_v3, %v1412_v5 }
0x1059   : > { %v1418_v7 = vmul.f32 %v1417_v6, %v1393_v4 }
0x105b   : > { %v1753_v30 = vclamps-f32 %v1418_v7, 1.0 }
0x105d   : > { %v1421_v9 = vadd.f32 1.0, %v1753_v30 }
0x105f   : > { %v1422_v15 = vmul.f32 %v1421_v9, %v1379_v8 }
0x1061   : > { %v1432_v10 = vpack.c.bf16 %v1422_v15, %v1422_v15 }
0x1063   : > { %1770 = vmatmul.msk.bf16.vlgmr.msra.gmra.mxu0 %vm952_vm4, %v1432_v10 }
0x10e0   : > { %v1471_v13 = vpop.f32.mrf.mxu0 }
0x10e1   : > { %v1472_v12 = vadd.f32 %v1893_v11, %v1471_v13 }
0x10e3   : > { %v1475_v14 = vadd.f32 %v1472_v12, %v2439_v22 }
0x10e5   : > { %v1478_v16 = vsel %vm449_vm3, %v1475_v14, 0.0 }
0x10e6   : > { %1479 = vadd.xlane.f32.xlu0 %v1478_v16 }
0x10e8   : > { %v1473_v17 = vpop.f32.mrf.mxu0 }
0x1159   : > { %v1480_v18 = vpop.xlane.xlu0 %1479 }
0x115a   : > { %v1481_v19 = vmul.f32 %v1480_v18, %v2261_v24 }
0x115c   : > { %v1482_v20 = vsub.f32 %v1475_v14, %v1481_v19 }
0x115e   : > { %v1483_v21 = vmul.f32 %v1482_v20, %v1482_v20 }
0x1160   : > { %v1484_v23 = vsel %vm449_vm3, %v1483_v21, 0.0 }
0x1161   : > { %1485 = vadd.xlane.f32.xlu0 %v1484_v23 }
0x11d4   : > { %v1486_v27 = vpop.xlane.xlu0 %1485 }
0x11d5   : > { %v1487_v28 = vmul.f32 %v1486_v27, %v2261_v24  ;;  %v1896_v24 = vld [vmem:[#allocation4 + $0x12] ss:$0 sm:$0xff] }
0x11d7   : > { %v1488_v22 = vadd.f32 1e-12, %v1487_v28 }
0x11d9   : > { %1943 = vrsqrt.f32 %v1488_v22  ;;  %vm1495_vm0 = vweird.f32 %v1488_v22 }
0x11df   : > { %v1944_v63 = vpop.eup %1943 }
0x11e0   : > { %v1490_v29 = vmul.f32 %v1944_v63, %v1488_v22  ;;  %vm1496_vm15 = vweird.f32 %v1944_v63 }
0x11e1   : > { %vm1497_vm1 = vmor %vm1495_vm0, %vm1496_vm15 }
0x11e2   : > { %v1491_v32 = vmul.f32 %v1944_v63, %v1490_v29 }
0x11e4   : > { %v1492_v31 = vmul.f32 0.5, %v1491_v32 }
0x11e6   : > { %v1493_v33 = vsub.f32 1.5, %v1492_v31 }
0x11e8   : > { %v1494_v34 = vmul.f32 %v1944_v63, %v1493_v33 }
0x11ea   : > { %v1498_v36 = vsel %vm1497_vm1, %v1944_v63, %v1494_v34 }
0x11eb   : > { %v1499_v37 = vmul.f32 %v1498_v36, %v1482_v20 }
0x11ed   : > { %v1501_v39 = vmul.f32 %v1894_v35, %v1499_v37 }
0x11ef   : > { %v1503_v40 = vadd.f32 %v1895_v38, %v1501_v39 }
0x11f1   : > { %v1509_v41 = vpack.c.bf16 %v1503_v40, %v1503_v40 }
0x11f3   : > { %1779 = vmatmul.msk.bf16.vlgmr.msra.gmra.mxu1 %vm449_vm3, %v1509_v41 }
0x1270   : > { %v1536_v42 = vpop.f32.mrf.mxu1 }
0x1271   : > { %v1537_v43 = vadd.f32 %v1896_v24, %v1536_v42 }
0x1273   : > { %v1540_v44 = vpack.c.bf16 %v1537_v43, %v1537_v43 }
0x1275   : > { %1541 = vst [vmem:[%s397_s23] sm:$0xf] %v1540_v44 }
0x1278   : > { %v1538_v45 = vpop.f32.mrf.mxu1 }
0x1279 PF: > { %s21_s27 = sadd.s32 1, %s2113_s27  }
0x127a   : > { %p18_p7 = scmp.ge.s32.totalorder %s21_s27, 4  }
0x127c   :  { %20 = sbr.rel (!%p18_p7) target bundleno = 3 (0x3), region = 110 }
0x1281   :  { %1561 = vsyncpa [#allocation3], 1 }
0x1282   :  { %1563 = vsyncpa [#allocation3 + $0x1], 1 }
0x1283   :  { %1564 = vsyncpa [#allocation5], 1 }
0x1284   :  { %1565 = vsyncpa [#allocation8], 1 }

</bundles_post_ra>
